<compile_context>
chip_gen: v5e
topology: v5e:2x2
jax: 0.10.0
libtpu: 0.0.40
codegen_flags: <defaults>
</compile_context>

<pallas_src>
import functools

import jax
import jax.numpy as jnp
from jax.experimental import pallas as pl
from jax.experimental.pallas import tpu as pltpu


# ---------------------------------------------------------------------------
# Pallas kernels: one full-K matmul per grid step
# ---------------------------------------------------------------------------
def conv_mm_lrelu_kernel(p_ref, w_ref, y_ref, *, slope):
    """patches(tm, K) @ w(K, Cp) + fused LeakyReLU (layer 1: no BatchNorm)."""
    acc = jnp.dot(p_ref[...], w_ref[...], preferred_element_type=jnp.float32)
    acc = jnp.maximum(acc, slope * acc)          # LeakyReLU, 0 < slope < 1
    y_ref[...] = acc.astype(y_ref.dtype)


def conv_mm_stats_kernel(p_ref, w_ref, y_ref, stats_ref):
    """patches(tm, K) @ w(K, Cp) + per-block per-channel (sum, sum_sq) partials."""
    acc = jnp.dot(p_ref[...], w_ref[...], preferred_element_type=jnp.float32)
    y_ref[...] = acc.astype(y_ref.dtype)
    s1 = jnp.sum(acc, axis=0, keepdims=True)         # (1, Cp)
    s2 = jnp.sum(acc * acc, axis=0, keepdims=True)   # (1, Cp)
    stats_ref[...] = jnp.concatenate([s1, s2], axis=0)[None, :, :]   # (1, 2, Cp)


# ---------------------------------------------------------------------------
# XLA-side layout helpers (single fused pass, all in bf16)
# ---------------------------------------------------------------------------
def _build_patches(x_nhwc):
    """Stride-2 / k=4 / pad=1 im2col at folded resolution: (N*OH*OW, 16*Cin) bf16."""
    n, h, w, cin = x_nhwc.shape
    oh, ow = h // 2, w // 2
    hf, wf = oh + 1, ow + 1
    xp = jnp.pad(x_nhwc, ((0, 0), (1, 1), (1, 1), (0, 0)))
    # fold 2x2 spatial blocks into channels: folded chan index = (sh, sw, c)
    xf = xp.reshape(n, hf, 2, wf, 2, cin).transpose(0, 1, 3, 2, 4, 5)
    xf = xf.reshape(n, hf, wf, 4 * cin)
    # 2x2 stride-1 window over the folded image -> concat 4 shifted slices.
    shifts = [xf[:, di:di + oh, dj:dj + ow, :]
              for di in range(2) for dj in range(2)]
    patches = jnp.concatenate(shifts, axis=-1)       # (n, oh, ow, 16*cin)
    return patches.reshape(n * oh * ow, 16 * cin)


def _fold_weights(w_oihw, cp):
    """4x4 kernel -> (16*Cin, Cp) matrix matching _build_patches' K ordering."""
    cout, cin = w_oihw.shape[0], w_oihw.shape[1]
    # (o, c, kh, kw) -> (o, c, di, sh, dj, sw) with kh = 2*di+sh, kw = 2*dj+sw
    w2 = w_oihw.reshape(cout, cin, 2, 2, 2, 2).transpose(2, 4, 3, 5, 1, 0)
    w2 = w2.reshape(16 * cin, cout)                  # row = (di,dj,sh,sw,c)
    w2 = jnp.pad(w2, ((0, 0), (0, cp - cout)))
    return w2.astype(jnp.bfloat16)


def _pick_tm(m, max_tm=512):
    """Largest multiple-of-8 divisor of m that is <= max_tm (or full m)."""
    if m <= max_tm:
        return m
    t = max_tm - (max_tm % 8)
    while t >= 8:
        if m % t == 0:
            return t
        t -= 8
    return m


# ---------------------------------------------------------------------------
# Conv wrapper: layout pass in XLA, one big matmul in Pallas
# ---------------------------------------------------------------------------
def conv4x4_s2(x_nhwc, w_oihw, *, emit_stats, slope=0.2, max_tm=512):
    """Conv2d(kernel=4, stride=2, padding=1, bias=False) on bf16 NHWC input."""
    n, h, w, cin = x_nhwc.shape
    oh, ow = h // 2, w // 2
    cout = w_oihw.shape[0]
    cp = pl.cdiv(cout, 128) * 128      # Cout padded to full 128-lane width
    k = 16 * cin
    m = n * oh * ow                    # batch folded into the matmul M dim

    patches = _build_patches(x_nhwc)               # (m, k)  bf16
    w2 = _fold_weights(w_oihw, cp)                 # (k, cp) bf16

    tm = _pick_tm(m, max_tm)
    grid = (m // tm,)

    p_spec = pl.BlockSpec((tm, k), lambda i: (i, 0))
    w_spec = pl.BlockSpec((k, cp), lambda i: (0, 0))
    y_spec = pl.BlockSpec((tm, cp), lambda i: (i, 0))
    y_shape = jax.ShapeDtypeStruct((m, cp), jnp.bfloat16)

    bytes_accessed = (m * k + k * cp + m * cp) * 2
    if emit_stats:
        bytes_accessed += grid[0] * 2 * cp * 4
    cost = pl.CostEstimate(flops=2 * m * k * cp, transcendentals=0,
                           bytes_accessed=bytes_accessed)

    if emit_stats:
        y2d, stats_blocks = pl.pallas_call(
            conv_mm_stats_kernel,
            grid=grid,
            in_specs=[p_spec, w_spec],
            out_specs=(y_spec, pl.BlockSpec((1, 2, cp), lambda i: (i, 0, 0))),
            out_shape=(y_shape,
                       jax.ShapeDtypeStruct((grid[0], 2, cp), jnp.float32)),
            compiler_params=pltpu.CompilerParams(
                dimension_semantics=("parallel",)),   # per-block partial stats
            cost_estimate=cost,
        )(patches, w2)
    else:
        y2d = pl.pallas_call(
            functools.partial(conv_mm_lrelu_kernel, slope=slope),
            grid=grid,
            in_specs=[p_spec, w_spec],
            out_specs=y_spec,
            out_shape=y_shape,
            compiler_params=pltpu.CompilerParams(
                dimension_semantics=("parallel",)),
            cost_estimate=cost,
        )(patches, w2)
        stats_blocks = None

    return y2d, stats_blocks, (n, oh, ow, cout)


def _bn_lrelu(y2d, stats_blocks, gamma, beta, count, *, eps, slope):
    """BatchNorm2d (batch stats, biased var) + LeakyReLU as a per-channel affine.

    Applied in plain JAX so XLA fuses it with the next layer's patch-building
    pass; the result is cast to bf16 BEFORE any layout op so no f32 intermediate
    is materialized between layers.
    """
    cout = gamma.shape[0]
    stats = jnp.sum(stats_blocks, axis=0)            # reduce per-block partials
    s1 = stats[0, :cout]
    s2 = stats[1, :cout]
    mean = s1 / count
    var = jnp.maximum(s2 / count - mean * mean, 0.0)
    scale = gamma * jax.lax.rsqrt(var + eps)
    shift = beta - mean * scale
    z = y2d[:, :cout].astype(jnp.float32) * scale + shift
    z = jnp.maximum(z, slope * z)                    # LeakyReLU
    return z.astype(jnp.bfloat16)


# ---------------------------------------------------------------------------
# Discriminator forward
# ---------------------------------------------------------------------------
def discriminator_forward(x_nchw, params, eps=1e-5, slope=0.2):
    n = x_nchw.shape[0]
    # NCHW -> NHWC, cast to bf16 before any pad/transpose (keeps layout pass bf16).
    x = jnp.transpose(x_nchw, (0, 2, 3, 1)).astype(jnp.bfloat16)

    # Conv(nc -> ndf) + LeakyReLU(0.2) fused in-kernel.
    y2d, _, (n_, oh, ow, cout) = conv4x4_s2(x, params["w1"],
                                            emit_stats=False, slope=slope)
    a = y2d[:, :cout].reshape(n, oh, ow, cout)

    # Conv + BN + LeakyReLU blocks: the conv kernel emits per-block sum/sum_sq;
    # BN normalize + LeakyReLU become an affine folded into the next layout pass.
    for idx in (2, 3, 4):
        y2d, stats_blocks, (_, oh, ow, cout) = conv4x4_s2(
            a, params[f"w{idx}"], emit_stats=True, slope=slope)
        count = y2d.shape[0]                          # = n * oh * ow
        z = _bn_lrelu(y2d, stats_blocks, params[f"g{idx}"], params[f"b{idx}"],
                      count, eps=eps, slope=slope)
        a = z.reshape(n, oh, ow, cout)

    # Final Conv(8ndf -> 1, k=4, s=1, p=0): one dot per sample, kept as an XLA dot
    # (1/128 MXU output columns -> not worth a pallas_call).
    w5 = params["w5"]                                        # [1, 8ndf, 4, 4]
    w5f = jnp.transpose(w5[0], (1, 2, 0)).reshape(-1, 1)     # [(kh,kw,c), 1]
    logits = a.reshape(n, -1).astype(jnp.float32) @ w5f.astype(jnp.float32)
    return logits.reshape(n, 1, 1, 1)                        # NCHW [N,1,1,1]


def init_params(key, nc, ndf):
    ks = jax.random.split(key, 5)
    shapes = [
        (ndf, nc, 4, 4),
        (ndf * 2, ndf, 4, 4),
        (ndf * 4, ndf * 2, 4, 4),
        (ndf * 8, ndf * 4, 4, 4),
        (1, ndf * 8, 4, 4),
    ]
    params = {}
    for i, (k, s) in enumerate(zip(ks, shapes), start=1):
        params[f"w{i}"] = jax.random.normal(k, s, jnp.float32) * 0.02
    for i, c in zip((2, 3, 4), (ndf * 2, ndf * 4, ndf * 8)):
        params[f"g{i}"] = jnp.ones((c,), jnp.float32)    # BatchNorm weight
        params[f"b{i}"] = jnp.zeros((c,), jnp.float32)   # BatchNorm bias
    return params


if __name__ == "__main__":
    nc, ndf = 3, 8
    key = jax.random.PRNGKey(0)
    kx, kp = jax.random.split(key)
    # 64x64 input: 4 stride-2 convs (64->32->16->8->4), then 4x4 valid conv -> 1x1.
    x = jax.random.normal(kx, (2, nc, 64, 64), jnp.float32)
    params = init_params(kp, nc, ndf)

    fwd = jax.jit(discriminator_forward)
    out = fwd(x, params)
    jax.block_until_ready(out)

    assert out.shape == (2, 1, 1, 1), out.shape
    assert out.dtype == jnp.float32, out.dtype
    assert bool(jnp.isfinite(out).all())
    print("KERNEL_OK")
</pallas_src>

<mosaic_0001>
module attributes {stable_mosaic.version = 11 : i64} {
  func.func @conv_mm_lrelu_kernel(%arg0: i32, %arg1: memref<512x48xbf16, #tpu.memory_space<vmem>>, %arg2: memref<48x128xbf16, #tpu.memory_space<vmem>>, %arg3: memref<512x128xbf16, #tpu.memory_space<vmem>>) attributes {dimension_semantics = [#tpu.dimension_semantics<parallel>], iteration_bounds = array<i64: 4>, scalar_prefetch = 0 : i64, scratch_operands = 0 : i64, tpu.core_type = #tpu.core_type<tc>, window_params = [{transform_indices = @transform_0, window_bounds = array<i64: 512, 48>}, {pipeline_mode = #tpu.pipeline_mode<synchronous>, transform_indices = @transform_1, window_bounds = array<i64: 48, 128>}, {transform_indices = @transform_2, window_bounds = array<i64: 512, 128>}]} {
    %c0 = arith.constant 0 : index
    %c0_0 = arith.constant 0 : index
    %0 = vector.load %arg1[%c0, %c0_0] : memref<512x48xbf16, #tpu.memory_space<vmem>>, vector<512x48xbf16>
    %c0_1 = arith.constant 0 : index
    %c0_2 = arith.constant 0 : index
    %1 = vector.load %arg2[%c0_1, %c0_2] : memref<48x128xbf16, #tpu.memory_space<vmem>>, vector<48x128xbf16>
    %cst = arith.constant dense<0.000000e+00> : vector<512x128xf32>
    %2 = tpu.matmul %0, %1, %cst {dimension_numbers = #tpu.dot_dimension_numbers<[1], [0], [0], [1], [0, 0, 1, 1], [], []>} : vector<512x48xbf16>, vector<48x128xbf16>, vector<512x128xf32> -> vector<512x128xf32>
    %cst_3 = arith.constant 2.000000e-01 : f32
    %3 = vector.broadcast %cst_3 : f32 to vector<512x128xf32>
    %4 = arith.mulf %3, %2 : vector<512x128xf32>
    %5 = arith.maximumf %2, %4 : vector<512x128xf32>
    %6 = arith.truncf %5 : vector<512x128xf32> to vector<512x128xbf16>
    %c0_4 = arith.constant 0 : index
    %c0_5 = arith.constant 0 : index
    %7 = vector.load %arg3[%c0_4, %c0_5] : memref<512x128xbf16, #tpu.memory_space<vmem>>, vector<512x128xbf16>
    tpu.vector_store %arg3[%c0_4, %c0_5], %6 {strides = array<i32>} : memref<512x128xbf16, #tpu.memory_space<vmem>>, vector<512x128xbf16>,
    return
  }
  func.func @transform_0(%arg0: i32) -> (i32, i32) {
    %c0_i32 = arith.constant 0 : i32
    %c0_i32_0 = arith.constant 0 : i32
    return %arg0, %c0_i32 : i32, i32
  }
  func.func @transform_1(%arg0: i32) -> (i32, i32) {
    %c0_i32 = arith.constant 0 : i32
    %c0_i32_0 = arith.constant 0 : i32
    %c0_i32_1 = arith.constant 0 : i32
    return %c0_i32, %c0_i32_0 : i32, i32
  }
  func.func @transform_2(%arg0: i32) -> (i32, i32) {
    %c0_i32 = arith.constant 0 : i32
    %c0_i32_0 = arith.constant 0 : i32
    return %arg0, %c0_i32 : i32, i32
  }
}

module attributes {stable_mosaic.version = 11 : i64} {
  func.func @conv_mm_stats_kernel(%arg0: i32, %arg1: memref<512x128xbf16, #tpu.memory_space<vmem>>, %arg2: memref<128x128xbf16, #tpu.memory_space<vmem>>, %arg3: memref<512x128xbf16, #tpu.memory_space<vmem>>, %arg4: memref<1x2x128xf32, #tpu.memory_space<vmem>>) attributes {dimension_semantics = [#tpu.dimension_semantics<parallel>], iteration_bounds = array<i64: 1>, scalar_prefetch = 0 : i64, scratch_operands = 0 : i64, tpu.core_type = #tpu.core_type<tc>, window_params = [{transform_indices = @transform_0, window_bounds = array<i64: 512, 128>}, {pipeline_mode = #tpu.pipeline_mode<synchronous>, transform_indices = @transform_1, window_bounds = array<i64: 128, 128>}, {transform_indices = @transform_2, window_bounds = array<i64: 512, 128>}, {transform_indices = @transform_3, window_bounds = array<i64: 1, 2, 128>}]} {
    %c0 = arith.constant 0 : index
    %c0_0 = arith.constant 0 : index
    %0 = vector.load %arg1[%c0, %c0_0] : memref<512x128xbf16, #tpu.memory_space<vmem>>, vector<512x128xbf16>
    %c0_1 = arith.constant 0 : index
    %c0_2 = arith.constant 0 : index
    %1 = vector.load %arg2[%c0_1, %c0_2] : memref<128x128xbf16, #tpu.memory_space<vmem>>, vector<128x128xbf16>
    %cst = arith.constant dense<0.000000e+00> : vector<512x128xf32>
    %2 = tpu.matmul %0, %1, %cst {dimension_numbers = #tpu.dot_dimension_numbers<[1], [0], [0], [1], [0, 0, 1, 1], [], []>} : vector<512x128xbf16>, vector<128x128xbf16>, vector<512x128xf32> -> vector<512x128xf32>
    %3 = arith.truncf %2 : vector<512x128xf32> to vector<512x128xbf16>
    %c0_3 = arith.constant 0 : index
    %c0_4 = arith.constant 0 : index
    %4 = vector.load %arg3[%c0_3, %c0_4] : memref<512x128xbf16, #tpu.memory_space<vmem>>, vector<512x128xbf16>
    tpu.vector_store %arg3[%c0_3, %c0_4], %3 {strides = array<i32>} : memref<512x128xbf16, #tpu.memory_space<vmem>>, vector<512x128xbf16>,
    %cst_5 = arith.constant dense<0.000000e+00> : vector<128xf32>
    %5 = vector.multi_reduction <add>, %2, %cst_5 [0] : vector<512x128xf32> to vector<128xf32>
    %6 = vector.shape_cast %5 : vector<128xf32> to vector<1x128xf32>
    %7 = arith.mulf %2, %2 : vector<512x128xf32>
    %cst_6 = arith.constant dense<0.000000e+00> : vector<128xf32>
    %8 = vector.multi_reduction <add>, %7, %cst_6 [0] : vector<512x128xf32> to vector<128xf32>
    %9 = vector.shape_cast %8 : vector<128xf32> to vector<1x128xf32>
    %10 = tpu.concatenate %6, %9 in 0 : vector<1x128xf32>, vector<1x128xf32> -> vector<2x128xf32>
    %11 = vector.shape_cast %10 : vector<2x128xf32> to vector<1x2x128xf32>
    %c0_7 = arith.constant 0 : index
    %c0_8 = arith.constant 0 : index
    %c0_9 = arith.constant 0 : index
    %12 = vector.load %arg4[%c0_7, %c0_8, %c0_9] : memref<1x2x128xf32, #tpu.memory_space<vmem>>, vector<1x2x128xf32>
    tpu.vector_store %arg4[%c0_7, %c0_8, %c0_9], %11 {strides = array<i32>} : memref<1x2x128xf32, #tpu.memory_space<vmem>>, vector<1x2x128xf32>,
    return
  }
  func.func @transform_0(%arg0: i32) -> (i32, i32) {
    %c0_i32 = arith.constant 0 : i32
    %c0_i32_0 = arith.constant 0 : i32
    return %arg0, %c0_i32 : i32, i32
  }
  func.func @transform_1(%arg0: i32) -> (i32, i32) {
    %c0_i32 = arith.constant 0 : i32
    %c0_i32_0 = arith.constant 0 : i32
    %c0_i32_1 = arith.constant 0 : i32
    return %c0_i32, %c0_i32_0 : i32, i32
  }
  func.func @transform_2(%arg0: i32) -> (i32, i32) {
    %c0_i32 = arith.constant 0 : i32
    %c0_i32_0 = arith.constant 0 : i32
    return %arg0, %c0_i32 : i32, i32
  }
  func.func @transform_3(%arg0: i32) -> (i32, i32, i32) {
    %c0_i32 = arith.constant 0 : i32
    %c0_i32_0 = arith.constant 0 : i32
    %c0_i32_1 = arith.constant 0 : i32
    return %arg0, %c0_i32, %c0_i32_0 : i32, i32, i32
  }
}

module attributes {stable_mosaic.version = 11 : i64} {
  func.func @conv_mm_stats_kernel(%arg0: i32, %arg1: memref<128x256xbf16, #tpu.memory_space<vmem>>, %arg2: memref<256x128xbf16, #tpu.memory_space<vmem>>, %arg3: memref<128x128xbf16, #tpu.memory_space<vmem>>, %arg4: memref<1x2x128xf32, #tpu.memory_space<vmem>>) attributes {dimension_semantics = [#tpu.dimension_semantics<parallel>], iteration_bounds = array<i64: 1>, scalar_prefetch = 0 : i64, scratch_operands = 0 : i64, tpu.core_type = #tpu.core_type<tc>, window_params = [{transform_indices = @transform_0, window_bounds = array<i64: 128, 256>}, {pipeline_mode = #tpu.pipeline_mode<synchronous>, transform_indices = @transform_1, window_bounds = array<i64: 256, 128>}, {transform_indices = @transform_2, window_bounds = array<i64: 128, 128>}, {transform_indices = @transform_3, window_bounds = array<i64: 1, 2, 128>}]} {
    %c0 = arith.constant 0 : index
    %c0_0 = arith.constant 0 : index
    %0 = vector.load %arg1[%c0, %c0_0] : memref<128x256xbf16, #tpu.memory_space<vmem>>, vector<128x256xbf16>
    %c0_1 = arith.constant 0 : index
    %c0_2 = arith.constant 0 : index
    %1 = vector.load %arg2[%c0_1, %c0_2] : memref<256x128xbf16, #tpu.memory_space<vmem>>, vector<256x128xbf16>
    %cst = arith.constant dense<0.000000e+00> : vector<128x128xf32>
    %2 = tpu.matmul %0, %1, %cst {dimension_numbers = #tpu.dot_dimension_numbers<[1], [0], [0], [1], [0, 0, 1, 1], [], []>} : vector<128x256xbf16>, vector<256x128xbf16>, vector<128x128xf32> -> vector<128x128xf32>
    %3 = arith.truncf %2 : vector<128x128xf32> to vector<128x128xbf16>
    %c0_3 = arith.constant 0 : index
    %c0_4 = arith.constant 0 : index
    %4 = vector.load %arg3[%c0_3, %c0_4] : memref<128x128xbf16, #tpu.memory_space<vmem>>, vector<128x128xbf16>
    tpu.vector_store %arg3[%c0_3, %c0_4], %3 {strides = array<i32>} : memref<128x128xbf16, #tpu.memory_space<vmem>>, vector<128x128xbf16>,
    %cst_5 = arith.constant dense<0.000000e+00> : vector<128xf32>
    %5 = vector.multi_reduction <add>, %2, %cst_5 [0] : vector<128x128xf32> to vector<128xf32>
    %6 = vector.shape_cast %5 : vector<128xf32> to vector<1x128xf32>
    %7 = arith.mulf %2, %2 : vector<128x128xf32>
    %cst_6 = arith.constant dense<0.000000e+00> : vector<128xf32>
    %8 = vector.multi_reduction <add>, %7, %cst_6 [0] : vector<128x128xf32> to vector<128xf32>
    %9 = vector.shape_cast %8 : vector<128xf32> to vector<1x128xf32>
    %10 = tpu.concatenate %6, %9 in 0 : vector<1x128xf32>, vector<1x128xf32> -> vector<2x128xf32>
    %11 = vector.shape_cast %10 : vector<2x128xf32> to vector<1x2x128xf32>
    %c0_7 = arith.constant 0 : index
    %c0_8 = arith.constant 0 : index
    %c0_9 = arith.constant 0 : index
    %12 = vector.load %arg4[%c0_7, %c0_8, %c0_9] : memref<1x2x128xf32, #tpu.memory_space<vmem>>, vector<1x2x128xf32>
    tpu.vector_store %arg4[%c0_7, %c0_8, %c0_9], %11 {strides = array<i32>} : memref<1x2x128xf32, #tpu.memory_space<vmem>>, vector<1x2x128xf32>,
    return
  }
  func.func @transform_0(%arg0: i32) -> (i32, i32) {
    %c0_i32 = arith.constant 0 : i32
    %c0_i32_0 = arith.constant 0 : i32
    return %arg0, %c0_i32 : i32, i32
  }
  func.func @transform_1(%arg0: i32) -> (i32, i32) {
    %c0_i32 = arith.constant 0 : i32
    %c0_i32_0 = arith.constant 0 : i32
    %c0_i32_1 = arith.constant 0 : i32
    return %c0_i32, %c0_i32_0 : i32, i32
  }
  func.func @transform_2(%arg0: i32) -> (i32, i32) {
    %c0_i32 = arith.constant 0 : i32
    %c0_i32_0 = arith.constant 0 : i32
    return %arg0, %c0_i32 : i32, i32
  }
  func.func @transform_3(%arg0: i32) -> (i32, i32, i32) {
    %c0_i32 = arith.constant 0 : i32
    %c0_i32_0 = arith.constant 0 : i32
    %c0_i32_1 = arith.constant 0 : i32
    return %arg0, %c0_i32, %c0_i32_0 : i32, i32, i32
  }
}

module attributes {stable_mosaic.version = 11 : i64} {
  func.func @conv_mm_stats_kernel(%arg0: i32, %arg1: memref<32x512xbf16, #tpu.memory_space<vmem>>, %arg2: memref<512x128xbf16, #tpu.memory_space<vmem>>, %arg3: memref<32x128xbf16, #tpu.memory_space<vmem>>, %arg4: memref<1x2x128xf32, #tpu.memory_space<vmem>>) attributes {dimension_semantics = [#tpu.dimension_semantics<parallel>], iteration_bounds = array<i64: 1>, scalar_prefetch = 0 : i64, scratch_operands = 0 : i64, tpu.core_type = #tpu.core_type<tc>, window_params = [{transform_indices = @transform_0, window_bounds = array<i64: 32, 512>}, {pipeline_mode = #tpu.pipeline_mode<synchronous>, transform_indices = @transform_1, window_bounds = array<i64: 512, 128>}, {transform_indices = @transform_2, window_bounds = array<i64: 32, 128>}, {transform_indices = @transform_3, window_bounds = array<i64: 1, 2, 128>}]} {
    %c0 = arith.constant 0 : index
    %c0_0 = arith.constant 0 : index
    %0 = vector.load %arg1[%c0, %c0_0] : memref<32x512xbf16, #tpu.memory_space<vmem>>, vector<32x512xbf16>
    %c0_1 = arith.constant 0 : index
    %c0_2 = arith.constant 0 : index
    %1 = vector.load %arg2[%c0_1, %c0_2] : memref<512x128xbf16, #tpu.memory_space<vmem>>, vector<512x128xbf16>
    %cst = arith.constant dense<0.000000e+00> : vector<32x128xf32>
    %2 = tpu.matmul %0, %1, %cst {dimension_numbers = #tpu.dot_dimension_numbers<[1], [0], [0], [1], [0, 0, 1, 1], [], []>} : vector<32x512xbf16>, vector<512x128xbf16>, vector<32x128xf32> -> vector<32x128xf32>
    %3 = arith.truncf %2 : vector<32x128xf32> to vector<32x128xbf16>
    %c0_3 = arith.constant 0 : index
    %c0_4 = arith.constant 0 : index
    %4 = vector.load %arg3[%c0_3, %c0_4] : memref<32x128xbf16, #tpu.memory_space<vmem>>, vector<32x128xbf16>
    tpu.vector_store %arg3[%c0_3, %c0_4], %3 {strides = array<i32>} : memref<32x128xbf16, #tpu.memory_space<vmem>>, vector<32x128xbf16>,
    %cst_5 = arith.constant dense<0.000000e+00> : vector<128xf32>
    %5 = vector.multi_reduction <add>, %2, %cst_5 [0] : vector<32x128xf32> to vector<128xf32>
    %6 = vector.shape_cast %5 : vector<128xf32> to vector<1x128xf32>
    %7 = arith.mulf %2, %2 : vector<32x128xf32>
    %cst_6 = arith.constant dense<0.000000e+00> : vector<128xf32>
    %8 = vector.multi_reduction <add>, %7, %cst_6 [0] : vector<32x128xf32> to vector<128xf32>
    %9 = vector.shape_cast %8 : vector<128xf32> to vector<1x128xf32>
    %10 = tpu.concatenate %6, %9 in 0 : vector<1x128xf32>, vector<1x128xf32> -> vector<2x128xf32>
    %11 = vector.shape_cast %10 : vector<2x128xf32> to vector<1x2x128xf32>
    %c0_7 = arith.constant 0 : index
    %c0_8 = arith.constant 0 : index
    %c0_9 = arith.constant 0 : index
    %12 = vector.load %arg4[%c0_7, %c0_8, %c0_9] : memref<1x2x128xf32, #tpu.memory_space<vmem>>, vector<1x2x128xf32>
    tpu.vector_store %arg4[%c0_7, %c0_8, %c0_9], %11 {strides = array<i32>} : memref<1x2x128xf32, #tpu.memory_space<vmem>>, vector<1x2x128xf32>,
    return
  }
  func.func @transform_0(%arg0: i32) -> (i32, i32) {
    %c0_i32 = arith.constant 0 : i32
    %c0_i32_0 = arith.constant 0 : i32
    return %arg0, %c0_i32 : i32, i32
  }
  func.func @transform_1(%arg0: i32) -> (i32, i32) {
    %c0_i32 = arith.constant 0 : i32
    %c0_i32_0 = arith.constant 0 : i32
    %c0_i32_1 = arith.constant 0 : i32
    return %c0_i32, %c0_i32_0 : i32, i32
  }
  func.func @transform_2(%arg0: i32) -> (i32, i32) {
    %c0_i32 = arith.constant 0 : i32
    %c0_i32_0 = arith.constant 0 : i32
    return %arg0, %c0_i32 : i32, i32
  }
  func.func @transform_3(%arg0: i32) -> (i32, i32, i32) {
    %c0_i32 = arith.constant 0 : i32
    %c0_i32_0 = arith.constant 0 : i32
    %c0_i32_1 = arith.constant 0 : i32
    return %arg0, %c0_i32, %c0_i32_0 : i32, i32, i32
  }
}

</mosaic_0001>

<bundles_post_ra>
// kernel: discriminator_forward.4
= control target key start
LH: loop header
LB: loop body
LE: loop exit
PB: predicated region body
PF: predicated region fallthrough
CT: control target
= control target key end

     0   :  { %s1423_s9 = smov 0   ;;  %s1556_s0 = inlined_call_operand.vmem [shape: bf16[2048,48], index: 0, kind: input, shape index: {}]   ;;  %s1557_s1 = inlined_call_operand.vmem [shape: bf16[48,128], index: 1, kind: input, shape index: {}]   ;;  %s1558_s2 = inlined_call_operand.vmem [shape: bf16[2048,128], index: 2, kind: output, shape index: {}]  }
   0x1 LB: > { %s974_s10 = sadd.s32 4294967295, %s1406_s9   ;;  %p978_p0 = scmp.ge.s32.totalorder %s1406_s9, 1  ;;  %s1406_s9 = sphi %s1423_s9, %s12_s9  }
   0x2   : > { %p113_p1 = scmp.lt.s32.totalorder %s1406_s9, 5 }
   0x4   : > { %p114_p2 = pnand %p978_p0, %p113_p1 }
   0x5   : > { %s979_s13 = sshll.u32 (!%p114_p2), %s974_s10, 6 }
   0x6   : > { %117 = sbr.rel (%p114_p2) target bundleno = 284 (0x11c), region = 28  ;;  %p136_p3 = scmp.lt.s32.totalorder (!%p114_p2), %s979_s13, 255 }
   0xb   : > { %v1191_v0 = vld [vmem:[%s1557_s1 + $0x10] sm:$0xff]  ;;  %v1190_v1 = vld [vmem:[%s1557_s1 + $0x8] sm:$0xff]  ;;  %s1560_s13 = smov (!%p136_p3, %s979_s13), 255  ;;  %v1189_v2 = vld [vmem:[%s1557_s1] sm:$0xff]  ;;  %vm396_vm0 = vcmask 392192  }
   0xc   : > { %498 = vmatpush.bf16.msra.mxu0 %v1191_v0  ;;  %1383 = vmatpush.bf16.msra.mxu1 %v1191_v0  ;;  %s980_s16 = sshll.u32 %s1560_s13, 2 }
   0xd   : > { %1384 = vmatpush.bf16.msra.mxu2 %v1191_v0  ;;  %1385 = vmatpush.bf16.msra.mxu3 %v1191_v0  ;;  %s1448_s21 = scalar_lea.vmem %s1556_s0, %s980_s16  ;;  %s1519_s24 = scalar_lea.vmem %s1558_s2, %s980_s16 }
   0xe   : > { %v1157_v3 = vld [vmem:[%s1448_s21] sm:$0xff]  ;;  %v1158_v7 = vld [vmem:[%s1448_s21 + $0x8] sm:$0xff]  ;;  %v1159_v11 = vld [vmem:[%s1448_s21 + $0x10] sm:$0xff] }
   0xf   : > { %v1165_v4 = vld [vmem:[%s1448_s21 + $0x40] sm:$0xff]  ;;  %v1166_v8 = vld [vmem:[%s1448_s21 + $0x48] sm:$0xff]  ;;  %v1167_v12 = vld [vmem:[%s1448_s21 + $0x50] sm:$0xff] }
  0x10   : > { %499 = vmatpush.bf16.msra.mxu0 %v1190_v1  ;;  %1386 = vmatpush.bf16.msra.mxu1 %v1190_v1  ;;  %v1173_v5 = vld [vmem:[%s1448_s21 + $0x80] sm:$0xff]  ;;  %v1174_v9 = vld [vmem:[%s1448_s21 + $0x88] sm:$0xff]  ;;  %v1175_v13 = vld [vmem:[%s1448_s21 + $0x90] sm:$0xff] }
  0x11   : > { %1387 = vmatpush.bf16.msra.mxu2 %v1190_v1  ;;  %1388 = vmatpush.bf16.msra.mxu3 %v1190_v1  ;;  %v1181_v6 = vld [vmem:[%s1448_s21 + $0xc0] sm:$0xff]  ;;  %v1182_v10 = vld [vmem:[%s1448_s21 + $0xc8] sm:$0xff]  ;;  %v1183_v14 = vld [vmem:[%s1448_s21 + $0xd0] sm:$0xff] }
  0x12   : > { %v1160_v15 = vld [vmem:[%s1448_s21 + $0x18] sm:$0xff]  ;;  %v1161_v19 = vld [vmem:[%s1448_s21 + $0x20] sm:$0xff]  ;;  %v1162_v23 = vld [vmem:[%s1448_s21 + $0x28] sm:$0xff] }
  0x13   : > { %v1168_v16 = vld [vmem:[%s1448_s21 + $0x58] sm:$0xff]  ;;  %v1169_v20 = vld [vmem:[%s1448_s21 + $0x60] sm:$0xff]  ;;  %v1170_v24 = vld [vmem:[%s1448_s21 + $0x68] sm:$0xff] }
  0x14   : > { %500 = vmatpush.bf16.msra.mxu0 %v1189_v2  ;;  %1389 = vmatpush.bf16.msra.mxu1 %v1189_v2  ;;  %v1176_v17 = vld [vmem:[%s1448_s21 + $0x98] sm:$0xff]  ;;  %v1177_v21 = vld [vmem:[%s1448_s21 + $0xa0] sm:$0xff]  ;;  %v1178_v25 = vld [vmem:[%s1448_s21 + $0xa8] sm:$0xff] }
  0x15   : > { %1390 = vmatpush.bf16.msra.mxu2 %v1189_v2  ;;  %1391 = vmatpush.bf16.msra.mxu3 %v1189_v2  ;;  %v1184_v18 = vld [vmem:[%s1448_s21 + $0xd8] sm:$0xff]  ;;  %v1185_v22 = vld [vmem:[%s1448_s21 + $0xe0] sm:$0xff]  ;;  %v1186_v26 = vld [vmem:[%s1448_s21 + $0xe8] sm:$0xff] }
  0x16   : > { %v1163_v27 = vld [vmem:[%s1448_s21 + $0x30] sm:$0xff]  ;;  %v1164_v31 = vld [vmem:[%s1448_s21 + $0x38] sm:$0xff] }
  0x17   : > { %1123 = vmatmul.msk.bf16.vlgmr.msra.gmra.mxu0 %vm396_vm0, %v1157_v3  ;;  %1131 = vmatmul.msk.bf16.vlgmr.msra.gmra.mxu1 %vm396_vm0, %v1165_v4  ;;  %v1171_v28 = vld [vmem:[%s1448_s21 + $0x70] sm:$0xff]  ;;  %v1172_v32 = vld [vmem:[%s1448_s21 + $0x78] sm:$0xff] }
  0x18   : > { %1139 = vmatmul.msk.bf16.vlgmr.msra.gmra.mxu2 %vm396_vm0, %v1173_v5  ;;  %1147 = vmatmul.msk.bf16.vlgmr.msra.gmra.mxu3 %vm396_vm0, %v1181_v6  ;;  %v1179_v29 = vld [vmem:[%s1448_s21 + $0xb0] sm:$0xff]  ;;  %v1180_v33 = vld [vmem:[%s1448_s21 + $0xb8] sm:$0xff] }
  0x19   : > { %v1187_v30 = vld [vmem:[%s1448_s21 + $0xf0] sm:$0xff]  ;;  %v1188_v34 = vld [vmem:[%s1448_s21 + $0xf8] sm:$0xff] }
  0x27   : > { %1124 = vmatmul.msk.bf16.gmra.mxu0 %vm396_vm0, %v1158_v7  ;;  %1132 = vmatmul.msk.bf16.gmra.mxu1 %vm396_vm0, %v1166_v8 }
  0x28   : > { %1140 = vmatmul.msk.bf16.gmra.mxu2 %vm396_vm0, %v1174_v9  ;;  %1148 = vmatmul.msk.bf16.gmra.mxu3 %vm396_vm0, %v1182_v10 }
  0x37   : > { %1125 = vmatmul.msk.bf16.gmra.mxu0 %vm396_vm0, %v1159_v11  ;;  %1133 = vmatmul.msk.bf16.gmra.mxu1 %vm396_vm0, %v1167_v12 }
  0x38   : > { %1141 = vmatmul.msk.bf16.gmra.mxu2 %vm396_vm0, %v1175_v13  ;;  %1149 = vmatmul.msk.bf16.gmra.mxu3 %vm396_vm0, %v1183_v14 }
  0x47   : > { %1126 = vmatmul.msk.bf16.gmra.mxu0 %vm396_vm0, %v1160_v15  ;;  %1134 = vmatmul.msk.bf16.gmra.mxu1 %vm396_vm0, %v1168_v16 }
  0x48   : > { %1142 = vmatmul.msk.bf16.gmra.mxu2 %vm396_vm0, %v1176_v17  ;;  %1150 = vmatmul.msk.bf16.gmra.mxu3 %vm396_vm0, %v1184_v18 }
  0x57   : > { %1127 = vmatmul.msk.bf16.gmra.mxu0 %vm396_vm0, %v1161_v19  ;;  %1135 = vmatmul.msk.bf16.gmra.mxu1 %vm396_vm0, %v1169_v20 }
  0x58   : > { %1143 = vmatmul.msk.bf16.gmra.mxu2 %vm396_vm0, %v1177_v21  ;;  %1151 = vmatmul.msk.bf16.gmra.mxu3 %vm396_vm0, %v1185_v22 }
  0x67   : > { %1128 = vmatmul.msk.bf16.gmra.mxu0 %vm396_vm0, %v1162_v23  ;;  %1136 = vmatmul.msk.bf16.gmra.mxu1 %vm396_vm0, %v1170_v24 }
  0x68   : > { %1144 = vmatmul.msk.bf16.gmra.mxu2 %vm396_vm0, %v1178_v25  ;;  %1152 = vmatmul.msk.bf16.gmra.mxu3 %vm396_vm0, %v1186_v26 }
  0x77   : > { %1129 = vmatmul.msk.bf16.gmra.mxu0 %vm396_vm0, %v1163_v27  ;;  %1137 = vmatmul.msk.bf16.gmra.mxu1 %vm396_vm0, %v1171_v28 }
  0x78   : > { %1145 = vmatmul.msk.bf16.gmra.mxu2 %vm396_vm0, %v1179_v29  ;;  %1153 = vmatmul.msk.bf16.gmra.mxu3 %vm396_vm0, %v1187_v30 }
  0x87   : > { %1130 = vmatmul.msk.bf16.gmra.mxu0 %vm396_vm0, %v1164_v31  ;;  %1138 = vmatmul.msk.bf16.gmra.mxu1 %vm396_vm0, %v1172_v32 }
  0x88   : > { %1146 = vmatmul.msk.bf16.gmra.mxu2 %vm396_vm0, %v1180_v33  ;;  %1154 = vmatmul.msk.bf16.gmra.mxu3 %vm396_vm0, %v1188_v34 }
  0x94   : > { %v502_v35 = vpop.f32.mrf.mxu0  ;;  %v542_v36 = vpop.f32.mrf.mxu1 }
  0x95   : > { %v662_v37 = vmul.f32 0.2, %v502_v35  ;;  %v678_v38 = vmul.f32 0.2, %v542_v36 }
  0x97   : > { %v726_v45 = vmax.f32 %v502_v35, %v662_v37  ;;  %v742_v46 = vmax.f32 %v542_v36, %v678_v38 }
  0x9b   : > { %v582_v39 = vpop.f32.mrf.mxu2  ;;  %v622_v40 = vpop.f32.mrf.mxu3 }
  0x9c   : > { %v504_v41 = vpop.f32.mrf.mxu0  ;;  %v544_v42 = vpop.f32.mrf.mxu1  ;;  %v694_v51 = vmul.f32 0.2, %v582_v39  ;;  %v710_v52 = vmul.f32 0.2, %v622_v40 }
  0x9d   : > { %v663_v43 = vmul.f32 0.2, %v504_v41  ;;  %v679_v44 = vmul.f32 0.2, %v544_v42 }
  0x9e   : > { %v758_v59 = vmax.f32 %v582_v39, %v694_v51  ;;  %v774_v60 = vmax.f32 %v622_v40, %v710_v52 }
  0x9f   : > { %v727_v47 = vmax.f32 %v504_v41, %v663_v43  ;;  %v743_v48 = vmax.f32 %v544_v42, %v679_v44 }
  0xa1   : > { %v1195_v49 = vpack.c.bf16 %v727_v47, %v726_v45  ;;  %v1235_v50 = vpack.c.bf16 %v743_v48, %v742_v46 }
  0xa3   : > { %1196 = vst [vmem:[%s1519_s24] sm:$0xff] %v1195_v49   ;;  %v584_v53 = vpop.f32.mrf.mxu2  ;;  %v624_v54 = vpop.f32.mrf.mxu3 }
  0xa4   : > { %1359 = vst [vmem:[%s1519_s24 + $0x40] sm:$0xff] %v1235_v50   ;;  %v695_v55 = vmul.f32 0.2, %v584_v53  ;;  %v711_v56 = vmul.f32 0.2, %v624_v54  ;;  %v507_v57 = vpop.f32.mrf.mxu0  ;;  %v547_v58 = vpop.f32.mrf.mxu1 }
  0xa5   : > { %v664_v1 = vmul.f32 0.2, %v507_v57  ;;  %v680_v2 = vmul.f32 0.2, %v547_v58 }
  0xa6   : > { %v759_v61 = vmax.f32 %v584_v53, %v695_v55  ;;  %v775_v62 = vmax.f32 %v624_v54, %v711_v56 }
  0xa7   : > { %v728_v9 = vmax.f32 %v507_v57, %v664_v1  ;;  %v744_v10 = vmax.f32 %v547_v58, %v680_v2 }
  0xa8   : > { %v1275_v63 = vpack.c.bf16 %v759_v61, %v758_v59  ;;  %v1315_v0 = vpack.c.bf16 %v775_v62, %v774_v60 }
  0xaa   : > { %1367 = vst [vmem:[%s1519_s24 + $0x80] sm:$0xff] %v1275_v63  }
  0xab   : > { %1375 = vst [vmem:[%s1519_s24 + $0xc0] sm:$0xff] %v1315_v0   ;;  %v587_v3 = vpop.f32.mrf.mxu2  ;;  %v627_v4 = vpop.f32.mrf.mxu3 }
  0xac   : > { %v509_v5 = vpop.f32.mrf.mxu0  ;;  %v549_v6 = vpop.f32.mrf.mxu1  ;;  %v696_v15 = vmul.f32 0.2, %v587_v3  ;;  %v712_v16 = vmul.f32 0.2, %v627_v4 }
  0xad   : > { %v665_v7 = vmul.f32 0.2, %v509_v5  ;;  %v681_v8 = vmul.f32 0.2, %v549_v6 }
  0xae   : > { %v760_v23 = vmax.f32 %v587_v3, %v696_v15  ;;  %v776_v24 = vmax.f32 %v627_v4, %v712_v16 }
  0xaf   : > { %v729_v11 = vmax.f32 %v509_v5, %v665_v7  ;;  %v745_v12 = vmax.f32 %v549_v6, %v681_v8 }
  0xb1   : > { %v1200_v13 = vpack.c.bf16 %v729_v11, %v728_v9  ;;  %v1240_v14 = vpack.c.bf16 %v745_v12, %v744_v10 }
  0xb3   : > { %1352 = vst [vmem:[%s1519_s24 + $0x8] sm:$0xff] %v1200_v13   ;;  %v589_v17 = vpop.f32.mrf.mxu2  ;;  %v629_v18 = vpop.f32.mrf.mxu3 }
  0xb4   : > { %1360 = vst [vmem:[%s1519_s24 + $0x48] sm:$0xff] %v1240_v14   ;;  %v697_v19 = vmul.f32 0.2, %v589_v17  ;;  %v713_v20 = vmul.f32 0.2, %v629_v18  ;;  %v512_v21 = vpop.f32.mrf.mxu0  ;;  %v552_v22 = vpop.f32.mrf.mxu1 }
  0xb5   : > { %v666_v29 = vmul.f32 0.2, %v512_v21  ;;  %v682_v30 = vmul.f32 0.2, %v552_v22 }
  0xb6   : > { %v761_v25 = vmax.f32 %v589_v17, %v697_v19  ;;  %v777_v26 = vmax.f32 %v629_v18, %v713_v20 }
  0xb7   : > { %v730_v37 = vmax.f32 %v512_v21, %v666_v29  ;;  %v746_v38 = vmax.f32 %v552_v22, %v682_v30 }
  0xb8   : > { %v1280_v27 = vpack.c.bf16 %v761_v25, %v760_v23  ;;  %v1320_v28 = vpack.c.bf16 %v777_v26, %v776_v24 }
  0xba   : > { %1368 = vst [vmem:[%s1519_s24 + $0x88] sm:$0xff] %v1280_v27  }
  0xbb   : > { %1376 = vst [vmem:[%s1519_s24 + $0xc8] sm:$0xff] %v1320_v28   ;;  %v592_v31 = vpop.f32.mrf.mxu2  ;;  %v632_v32 = vpop.f32.mrf.mxu3 }
  0xbc   : > { %v514_v33 = vpop.f32.mrf.mxu0  ;;  %v554_v34 = vpop.f32.mrf.mxu1  ;;  %v698_v43 = vmul.f32 0.2, %v592_v31  ;;  %v714_v44 = vmul.f32 0.2, %v632_v32 }
  0xbd   : > { %v667_v35 = vmul.f32 0.2, %v514_v33  ;;  %v683_v36 = vmul.f32 0.2, %v554_v34 }
  0xbe   : > { %v762_v51 = vmax.f32 %v592_v31, %v698_v43  ;;  %v778_v52 = vmax.f32 %v632_v32, %v714_v44 }
  0xbf   : > { %v731_v39 = vmax.f32 %v514_v33, %v667_v35  ;;  %v747_v40 = vmax.f32 %v554_v34, %v683_v36 }
  0xc1   : > { %v1205_v41 = vpack.c.bf16 %v731_v39, %v730_v37  ;;  %v1245_v42 = vpack.c.bf16 %v747_v40, %v746_v38 }
  0xc3   : > { %1353 = vst [vmem:[%s1519_s24 + $0x10] sm:$0xff] %v1205_v41   ;;  %v594_v45 = vpop.f32.mrf.mxu2  ;;  %v634_v46 = vpop.f32.mrf.mxu3 }
  0xc4   : > { %1361 = vst [vmem:[%s1519_s24 + $0x50] sm:$0xff] %v1245_v42   ;;  %v699_v47 = vmul.f32 0.2, %v594_v45  ;;  %v715_v48 = vmul.f32 0.2, %v634_v46  ;;  %v517_v49 = vpop.f32.mrf.mxu0  ;;  %v557_v50 = vpop.f32.mrf.mxu1 }
  0xc5   : > { %v668_v57 = vmul.f32 0.2, %v517_v49  ;;  %v684_v58 = vmul.f32 0.2, %v557_v50 }
  0xc6   : > { %v763_v53 = vmax.f32 %v594_v45, %v699_v47  ;;  %v779_v54 = vmax.f32 %v634_v46, %v715_v48 }
  0xc7   : > { %v732_v1 = vmax.f32 %v517_v49, %v668_v57  ;;  %v748_v2 = vmax.f32 %v557_v50, %v684_v58 }
  0xc8   : > { %v1285_v55 = vpack.c.bf16 %v763_v53, %v762_v51  ;;  %v1325_v56 = vpack.c.bf16 %v779_v54, %v778_v52 }
  0xca   : > { %1369 = vst [vmem:[%s1519_s24 + $0x90] sm:$0xff] %v1285_v55  }
  0xcb   : > { %1377 = vst [vmem:[%s1519_s24 + $0xd0] sm:$0xff] %v1325_v56   ;;  %v597_v59 = vpop.f32.mrf.mxu2  ;;  %v637_v60 = vpop.f32.mrf.mxu3 }
  0xcc   : > { %v519_v61 = vpop.f32.mrf.mxu0  ;;  %v559_v62 = vpop.f32.mrf.mxu1  ;;  %v700_v7 = vmul.f32 0.2, %v597_v59  ;;  %v716_v8 = vmul.f32 0.2, %v637_v60 }
  0xcd   : > { %v669_v63 = vmul.f32 0.2, %v519_v61  ;;  %v685_v0 = vmul.f32 0.2, %v559_v62 }
  0xce   : > { %v764_v15 = vmax.f32 %v597_v59, %v700_v7  ;;  %v780_v16 = vmax.f32 %v637_v60, %v716_v8 }
  0xcf   : > { %v733_v3 = vmax.f32 %v519_v61, %v669_v63  ;;  %v749_v4 = vmax.f32 %v559_v62, %v685_v0 }
  0xd1   : > { %v1210_v5 = vpack.c.bf16 %v733_v3, %v732_v1  ;;  %v1250_v6 = vpack.c.bf16 %v749_v4, %v748_v2 }
  0xd3   : > { %1354 = vst [vmem:[%s1519_s24 + $0x18] sm:$0xff] %v1210_v5   ;;  %v599_v9 = vpop.f32.mrf.mxu2  ;;  %v639_v10 = vpop.f32.mrf.mxu3 }
  0xd4   : > { %1362 = vst [vmem:[%s1519_s24 + $0x58] sm:$0xff] %v1250_v6   ;;  %v701_v11 = vmul.f32 0.2, %v599_v9  ;;  %v717_v12 = vmul.f32 0.2, %v639_v10  ;;  %v522_v13 = vpop.f32.mrf.mxu0  ;;  %v562_v14 = vpop.f32.mrf.mxu1 }
  0xd5   : > { %v670_v21 = vmul.f32 0.2, %v522_v13  ;;  %v686_v22 = vmul.f32 0.2, %v562_v14 }
  0xd6   : > { %v765_v17 = vmax.f32 %v599_v9, %v701_v11  ;;  %v781_v18 = vmax.f32 %v639_v10, %v717_v12 }
  0xd7   : > { %v734_v29 = vmax.f32 %v522_v13, %v670_v21  ;;  %v750_v30 = vmax.f32 %v562_v14, %v686_v22 }
  0xd8   : > { %v1290_v19 = vpack.c.bf16 %v765_v17, %v764_v15  ;;  %v1330_v20 = vpack.c.bf16 %v781_v18, %v780_v16 }
  0xda   : > { %1370 = vst [vmem:[%s1519_s24 + $0x98] sm:$0xff] %v1290_v19  }
  0xdb   : > { %1378 = vst [vmem:[%s1519_s24 + $0xd8] sm:$0xff] %v1330_v20   ;;  %v602_v23 = vpop.f32.mrf.mxu2  ;;  %v642_v24 = vpop.f32.mrf.mxu3 }
  0xdc   : > { %v524_v25 = vpop.f32.mrf.mxu0  ;;  %v564_v26 = vpop.f32.mrf.mxu1  ;;  %v702_v35 = vmul.f32 0.2, %v602_v23  ;;  %v718_v36 = vmul.f32 0.2, %v642_v24 }
  0xdd   : > { %v671_v27 = vmul.f32 0.2, %v524_v25  ;;  %v687_v28 = vmul.f32 0.2, %v564_v26 }
  0xde   : > { %v766_v43 = vmax.f32 %v602_v23, %v702_v35  ;;  %v782_v44 = vmax.f32 %v642_v24, %v718_v36 }
  0xdf   : > { %v735_v31 = vmax.f32 %v524_v25, %v671_v27  ;;  %v751_v32 = vmax.f32 %v564_v26, %v687_v28 }
  0xe1   : > { %v1215_v33 = vpack.c.bf16 %v735_v31, %v734_v29  ;;  %v1255_v34 = vpack.c.bf16 %v751_v32, %v750_v30 }
  0xe3   : > { %1355 = vst [vmem:[%s1519_s24 + $0x20] sm:$0xff] %v1215_v33   ;;  %v604_v37 = vpop.f32.mrf.mxu2  ;;  %v644_v38 = vpop.f32.mrf.mxu3 }
  0xe4   : > { %1363 = vst [vmem:[%s1519_s24 + $0x60] sm:$0xff] %v1255_v34   ;;  %v703_v39 = vmul.f32 0.2, %v604_v37  ;;  %v719_v40 = vmul.f32 0.2, %v644_v38  ;;  %v527_v41 = vpop.f32.mrf.mxu0  ;;  %v567_v42 = vpop.f32.mrf.mxu1 }
  0xe5   : > { %v672_v49 = vmul.f32 0.2, %v527_v41  ;;  %v688_v50 = vmul.f32 0.2, %v567_v42 }
  0xe6   : > { %v767_v45 = vmax.f32 %v604_v37, %v703_v39  ;;  %v783_v46 = vmax.f32 %v644_v38, %v719_v40 }
  0xe7   : > { %v736_v57 = vmax.f32 %v527_v41, %v672_v49  ;;  %v752_v58 = vmax.f32 %v567_v42, %v688_v50 }
  0xe8   : > { %v1295_v47 = vpack.c.bf16 %v767_v45, %v766_v43  ;;  %v1335_v48 = vpack.c.bf16 %v783_v46, %v782_v44 }
  0xea   : > { %1371 = vst [vmem:[%s1519_s24 + $0xa0] sm:$0xff] %v1295_v47  }
  0xeb   : > { %1379 = vst [vmem:[%s1519_s24 + $0xe0] sm:$0xff] %v1335_v48   ;;  %v607_v51 = vpop.f32.mrf.mxu2  ;;  %v647_v52 = vpop.f32.mrf.mxu3 }
  0xec   : > { %v529_v53 = vpop.f32.mrf.mxu0  ;;  %v569_v54 = vpop.f32.mrf.mxu1  ;;  %v704_v63 = vmul.f32 0.2, %v607_v51  ;;  %v720_v0 = vmul.f32 0.2, %v647_v52 }
  0xed   : > { %v673_v55 = vmul.f32 0.2, %v529_v53  ;;  %v689_v56 = vmul.f32 0.2, %v569_v54 }
  0xee   : > { %v768_v7 = vmax.f32 %v607_v51, %v704_v63  ;;  %v784_v8 = vmax.f32 %v647_v52, %v720_v0 }
  0xef   : > { %v737_v59 = vmax.f32 %v529_v53, %v673_v55  ;;  %v753_v60 = vmax.f32 %v569_v54, %v689_v56 }
  0xf1   : > { %v1220_v61 = vpack.c.bf16 %v737_v59, %v736_v57  ;;  %v1260_v62 = vpack.c.bf16 %v753_v60, %v752_v58 }
  0xf3   : > { %1356 = vst [vmem:[%s1519_s24 + $0x28] sm:$0xff] %v1220_v61   ;;  %v609_v1 = vpop.f32.mrf.mxu2  ;;  %v649_v2 = vpop.f32.mrf.mxu3 }
  0xf4   : > { %1364 = vst [vmem:[%s1519_s24 + $0x68] sm:$0xff] %v1260_v62   ;;  %v705_v3 = vmul.f32 0.2, %v609_v1  ;;  %v721_v4 = vmul.f32 0.2, %v649_v2  ;;  %v532_v5 = vpop.f32.mrf.mxu0  ;;  %v572_v6 = vpop.f32.mrf.mxu1 }
  0xf5   : > { %v674_v13 = vmul.f32 0.2, %v532_v5  ;;  %v690_v14 = vmul.f32 0.2, %v572_v6 }
  0xf6   : > { %v769_v9 = vmax.f32 %v609_v1, %v705_v3  ;;  %v785_v10 = vmax.f32 %v649_v2, %v721_v4 }
  0xf7   : > { %v738_v21 = vmax.f32 %v532_v5, %v674_v13  ;;  %v754_v22 = vmax.f32 %v572_v6, %v690_v14 }
  0xf8   : > { %v1300_v11 = vpack.c.bf16 %v769_v9, %v768_v7  ;;  %v1340_v12 = vpack.c.bf16 %v785_v10, %v784_v8 }
  0xfa   : > { %1372 = vst [vmem:[%s1519_s24 + $0xa8] sm:$0xff] %v1300_v11  }
  0xfb   : > { %1380 = vst [vmem:[%s1519_s24 + $0xe8] sm:$0xff] %v1340_v12   ;;  %v612_v15 = vpop.f32.mrf.mxu2  ;;  %v652_v16 = vpop.f32.mrf.mxu3 }
  0xfc   : > { %v534_v17 = vpop.f32.mrf.mxu0  ;;  %v574_v18 = vpop.f32.mrf.mxu1  ;;  %v706_v27 = vmul.f32 0.2, %v612_v15  ;;  %v722_v28 = vmul.f32 0.2, %v652_v16 }
  0xfd   : > { %v675_v19 = vmul.f32 0.2, %v534_v17  ;;  %v691_v20 = vmul.f32 0.2, %v574_v18 }
  0xfe   : > { %v770_v35 = vmax.f32 %v612_v15, %v706_v27  ;;  %v786_v36 = vmax.f32 %v652_v16, %v722_v28 }
  0xff   : > { %v739_v23 = vmax.f32 %v534_v17, %v675_v19  ;;  %v755_v24 = vmax.f32 %v574_v18, %v691_v20 }
 0x101   : > { %v1225_v25 = vpack.c.bf16 %v739_v23, %v738_v21  ;;  %v1265_v26 = vpack.c.bf16 %v755_v24, %v754_v22 }
 0x103   : > { %1357 = vst [vmem:[%s1519_s24 + $0x30] sm:$0xff] %v1225_v25   ;;  %v614_v29 = vpop.f32.mrf.mxu2  ;;  %v654_v30 = vpop.f32.mrf.mxu3 }
 0x104   : > { %1365 = vst [vmem:[%s1519_s24 + $0x70] sm:$0xff] %v1265_v26   ;;  %v707_v31 = vmul.f32 0.2, %v614_v29  ;;  %v723_v32 = vmul.f32 0.2, %v654_v30  ;;  %v537_v33 = vpop.f32.mrf.mxu0  ;;  %v577_v34 = vpop.f32.mrf.mxu1 }
 0x105   : > { %v676_v41 = vmul.f32 0.2, %v537_v33  ;;  %v692_v42 = vmul.f32 0.2, %v577_v34 }
 0x106   : > { %v771_v37 = vmax.f32 %v614_v29, %v707_v31  ;;  %v787_v38 = vmax.f32 %v654_v30, %v723_v32 }
 0x107   : > { %v740_v49 = vmax.f32 %v537_v33, %v676_v41  ;;  %v756_v50 = vmax.f32 %v577_v34, %v692_v42 }
 0x108   : > { %v1305_v39 = vpack.c.bf16 %v771_v37, %v770_v35  ;;  %v1345_v40 = vpack.c.bf16 %v787_v38, %v786_v36 }
 0x10a   : > { %1373 = vst [vmem:[%s1519_s24 + $0xb0] sm:$0xff] %v1305_v39  }
 0x10b   : > { %1381 = vst [vmem:[%s1519_s24 + $0xf0] sm:$0xff] %v1345_v40   ;;  %v617_v43 = vpop.f32.mrf.mxu2  ;;  %v657_v44 = vpop.f32.mrf.mxu3 }
 0x10c   : > { %v539_v45 = vpop.f32.mrf.mxu0  ;;  %v579_v46 = vpop.f32.mrf.mxu1  ;;  %v708_v55 = vmul.f32 0.2, %v617_v43  ;;  %v724_v56 = vmul.f32 0.2, %v657_v44 }
 0x10d   : > { %v677_v47 = vmul.f32 0.2, %v539_v45  ;;  %v693_v48 = vmul.f32 0.2, %v579_v46 }
 0x10e   : > { %v772_v61 = vmax.f32 %v617_v43, %v708_v55  ;;  %v788_v62 = vmax.f32 %v657_v44, %v724_v56 }
 0x10f   : > { %v741_v51 = vmax.f32 %v539_v45, %v677_v47  ;;  %v757_v52 = vmax.f32 %v579_v46, %v693_v48 }
 0x111   : > { %v1230_v53 = vpack.c.bf16 %v741_v51, %v740_v49  ;;  %v1270_v54 = vpack.c.bf16 %v757_v52, %v756_v50 }
 0x113   : > { %1358 = vst [vmem:[%s1519_s24 + $0x38] sm:$0xff] %v1230_v53   ;;  %v619_v57 = vpop.f32.mrf.mxu2  ;;  %v659_v58 = vpop.f32.mrf.mxu3 }
 0x114   : > { %1366 = vst [vmem:[%s1519_s24 + $0x78] sm:$0xff] %v1270_v54   ;;  %v709_v59 = vmul.f32 0.2, %v619_v57  ;;  %v725_v60 = vmul.f32 0.2, %v659_v58 }
 0x116   : > { %v773_v63 = vmax.f32 %v619_v57, %v709_v59  ;;  %v789_v0 = vmax.f32 %v659_v58, %v725_v60 }
 0x118   : > { %v1310_v1 = vpack.c.bf16 %v773_v63, %v772_v61  ;;  %v1350_v2 = vpack.c.bf16 %v789_v0, %v788_v62 }
 0x11a   : > { %1374 = vst [vmem:[%s1519_s24 + $0xb8] sm:$0xff] %v1310_v1  }
 0x11b   : > { %1382 = vst [vmem:[%s1519_s24 + $0xf8] sm:$0xff] %v1350_v2  }
 0x11c PF: > { %s12_s9 = sadd.s32 1, %s1406_s9  }
 0x11d   : > { %p9_p4 = scmp.ge.s32.totalorder %s12_s9, 6  }
 0x11f   :  { %11 = sbr.rel (!%p9_p4) target bundleno = 1 (0x1), region = 58 }

// kernel: discriminator_forward.5
= control target key start
LH: loop header
LB: loop body
LE: loop exit
PB: predicated region body
PF: predicated region fallthrough
CT: control target
= control target key end

     0   :  { %vm832_vm0 = vcmask 1040384   ;;  %s1785_s1 = inlined_call_operand.vmem [shape: bf16[128,128], index: 1, kind: input, shape index: {}]   ;;  %s1786_s0 = inlined_call_operand.vmem [shape: bf16[512,128], index: 0, kind: input, shape index: {}]   ;;  %s1787_s2 = inlined_call_operand.vmem [shape: bf16[512,128], index: 2, kind: output, shape index: {0}]   ;;  %s1788_s3 = inlined_call_operand.vmem [shape: f32[1,2,128], index: 3, kind: output, shape index: {1}]  }
   0x1   :  { %v1042_v0 = vld [vmem:[%s1785_s1 + $0x38] sm:$0xff]  ;;  %v1041_v1 = vld [vmem:[%s1785_s1 + $0x30] sm:$0xff]  ;;  %v1040_v2 = vld [vmem:[%s1785_s1 + $0x28] sm:$0xff] }
   0x2   :  { %333 = vmatpush.bf16.msra.mxu0 %v1042_v0  ;;  %1234 = vmatpush.bf16.msra.mxu1 %v1042_v0  ;;  %v1039_v3 = vld [vmem:[%s1785_s1 + $0x20] sm:$0xff]  ;;  %v1038_v4 = vld [vmem:[%s1785_s1 + $0x18] sm:$0xff]  ;;  %v1037_v5 = vld [vmem:[%s1785_s1 + $0x10] sm:$0xff] }
   0x3   :  { %1235 = vmatpush.bf16.msra.mxu2 %v1042_v0  ;;  %1236 = vmatpush.bf16.msra.mxu3 %v1042_v0  ;;  %v1036_v6 = vld [vmem:[%s1785_s1 + $0x8] sm:$0xff]  ;;  %v1035_v7 = vld [vmem:[%s1785_s1] sm:$0xff]  ;;  %v1005_v13 = vld [vmem:[%s1786_s0 + $0x10] sm:$0xff] }
   0x4   :  { %v1003_v8 = vld [vmem:[%s1786_s0] sm:$0xff]  ;;  %v1004_v10 = vld [vmem:[%s1786_s0 + $0x8] sm:$0xff]  ;;  %v1013_v14 = vld [vmem:[%s1786_s0 + $0x50] sm:$0xff] }
   0x5   :  { %v1011_v9 = vld [vmem:[%s1786_s0 + $0x40] sm:$0xff]  ;;  %v1012_v11 = vld [vmem:[%s1786_s0 + $0x48] sm:$0xff]  ;;  %v1006_v16 = vld [vmem:[%s1786_s0 + $0x18] sm:$0xff] }
   0x6   :  { %334 = vmatpush.bf16.msra.mxu0 %v1041_v1  ;;  %1237 = vmatpush.bf16.msra.mxu1 %v1041_v1  ;;  %v1019_v12 = vld [vmem:[%s1786_s0 + $0x80] sm:$0xff]  ;;  %v1020_v15 = vld [vmem:[%s1786_s0 + $0x88] sm:$0xff]  ;;  %v1014_v17 = vld [vmem:[%s1786_s0 + $0x58] sm:$0xff] }
   0x7   :  { %1238 = vmatpush.bf16.msra.mxu2 %v1041_v1  ;;  %1239 = vmatpush.bf16.msra.mxu3 %v1041_v1  ;;  %v1021_v18 = vld [vmem:[%s1786_s0 + $0x90] sm:$0xff]  ;;  %v1027_v19 = vld [vmem:[%s1786_s0 + $0xc0] sm:$0xff]  ;;  %v1022_v22 = vld [vmem:[%s1786_s0 + $0x98] sm:$0xff] }
   0x8   :  { %v1007_v20 = vld [vmem:[%s1786_s0 + $0x20] sm:$0xff]  ;;  %v1028_v23 = vld [vmem:[%s1786_s0 + $0xc8] sm:$0xff]  ;;  %v1029_v27 = vld [vmem:[%s1786_s0 + $0xd0] sm:$0xff] }
   0x9   :  { %v1015_v21 = vld [vmem:[%s1786_s0 + $0x60] sm:$0xff]  ;;  %v1008_v24 = vld [vmem:[%s1786_s0 + $0x28] sm:$0xff]  ;;  %v1009_v28 = vld [vmem:[%s1786_s0 + $0x30] sm:$0xff] }
   0xa   :  { %335 = vmatpush.bf16.msra.mxu0 %v1040_v2  ;;  %1240 = vmatpush.bf16.msra.mxu1 %v1040_v2  ;;  %v1016_v25 = vld [vmem:[%s1786_s0 + $0x68] sm:$0xff]  ;;  %v1023_v26 = vld [vmem:[%s1786_s0 + $0xa0] sm:$0xff]  ;;  %v1017_v29 = vld [vmem:[%s1786_s0 + $0x70] sm:$0xff] }
   0xb   :  { %1241 = vmatpush.bf16.msra.mxu2 %v1040_v2  ;;  %1242 = vmatpush.bf16.msra.mxu3 %v1040_v2  ;;  %v1024_v30 = vld [vmem:[%s1786_s0 + $0xa8] sm:$0xff]  ;;  %v1030_v31 = vld [vmem:[%s1786_s0 + $0xd8] sm:$0xff]  ;;  %v1025_v34 = vld [vmem:[%s1786_s0 + $0xb0] sm:$0xff] }
   0xc   :  { %v1010_v32 = vld [vmem:[%s1786_s0 + $0x38] sm:$0xff]  ;;  %v1031_v35 = vld [vmem:[%s1786_s0 + $0xe0] sm:$0xff]  ;;  %v1032_v39 = vld [vmem:[%s1786_s0 + $0xe8] sm:$0xff] }
   0xd   :  { %v1018_v33 = vld [vmem:[%s1786_s0 + $0x78] sm:$0xff]  ;;  %v1033_v53 = vld [vmem:[%s1786_s0 + $0xf0] sm:$0xff] }
   0xe   :  { %336 = vmatpush.bf16.msra.mxu0 %v1039_v3  ;;  %1243 = vmatpush.bf16.msra.mxu1 %v1039_v3  ;;  %v1026_v38 = vld [vmem:[%s1786_s0 + $0xb8] sm:$0xff] }
   0xf   :  { %1244 = vmatpush.bf16.msra.mxu2 %v1039_v3  ;;  %1245 = vmatpush.bf16.msra.mxu3 %v1039_v3 }
  0x12   :  { %337 = vmatpush.bf16.msra.mxu0 %v1038_v4  ;;  %1246 = vmatpush.bf16.msra.mxu1 %v1038_v4 }
  0x13   :  { %1247 = vmatpush.bf16.msra.mxu2 %v1038_v4  ;;  %1248 = vmatpush.bf16.msra.mxu3 %v1038_v4 }
  0x16   :  { %338 = vmatpush.bf16.msra.mxu0 %v1037_v5  ;;  %1249 = vmatpush.bf16.msra.mxu1 %v1037_v5 }
  0x17   :  { %1250 = vmatpush.bf16.msra.mxu2 %v1037_v5  ;;  %1251 = vmatpush.bf16.msra.mxu3 %v1037_v5  ;;  %v1034_v5 = vld [vmem:[%s1786_s0 + $0xf8] sm:$0xff] }
  0x1a   :  { %339 = vmatpush.bf16.msra.mxu0 %v1036_v6  ;;  %1252 = vmatpush.bf16.msra.mxu1 %v1036_v6 }
  0x1b   :  { %1253 = vmatpush.bf16.msra.mxu2 %v1036_v6  ;;  %1254 = vmatpush.bf16.msra.mxu3 %v1036_v6 }
  0x1e   :  { %340 = vmatpush.bf16.msra.mxu0 %v1035_v7  ;;  %1255 = vmatpush.bf16.msra.mxu1 %v1035_v7 }
  0x1f   :  { %1256 = vmatpush.bf16.msra.mxu2 %v1035_v7  ;;  %1257 = vmatpush.bf16.msra.mxu3 %v1035_v7 }
  0x21   :  { %341 = vmatmul.bf16.vlgmr.msra.gmra.mxu0 %v1003_v8  ;;  %381 = vmatmul.bf16.vlgmr.msra.gmra.mxu1 %v1011_v9 }
  0x22   :  { %421 = vmatmul.bf16.vlgmr.msra.gmra.mxu2 %v1019_v12  ;;  %461 = vmatmul.bf16.vlgmr.msra.gmra.mxu3 %v1027_v19 }
  0x31   :  { %346 = vmatmul.bf16.gmra.mxu0 %v1004_v10  ;;  %386 = vmatmul.bf16.gmra.mxu1 %v1012_v11 }
  0x32   :  { %426 = vmatmul.bf16.gmra.mxu2 %v1020_v15  ;;  %466 = vmatmul.bf16.gmra.mxu3 %v1028_v23 }
  0x41   :  { %351 = vmatmul.bf16.gmra.mxu0 %v1005_v13  ;;  %391 = vmatmul.bf16.gmra.mxu1 %v1013_v14 }
  0x42   :  { %431 = vmatmul.bf16.gmra.mxu2 %v1021_v18  ;;  %471 = vmatmul.bf16.gmra.mxu3 %v1029_v27 }
  0x51   :  { %356 = vmatmul.bf16.gmra.mxu0 %v1006_v16  ;;  %396 = vmatmul.bf16.gmra.mxu1 %v1014_v17 }
  0x52   :  { %436 = vmatmul.bf16.gmra.mxu2 %v1022_v22  ;;  %476 = vmatmul.bf16.gmra.mxu3 %v1030_v31 }
  0x61   :  { %361 = vmatmul.bf16.gmra.mxu0 %v1007_v20  ;;  %401 = vmatmul.bf16.gmra.mxu1 %v1015_v21 }
  0x62   :  { %441 = vmatmul.bf16.gmra.mxu2 %v1023_v26  ;;  %481 = vmatmul.bf16.gmra.mxu3 %v1031_v35 }
  0x71   :  { %366 = vmatmul.bf16.gmra.mxu0 %v1008_v24  ;;  %406 = vmatmul.bf16.gmra.mxu1 %v1016_v25 }
  0x72   :  { %446 = vmatmul.bf16.gmra.mxu2 %v1024_v30  ;;  %486 = vmatmul.bf16.gmra.mxu3 %v1032_v39 }
  0x81   :  { %371 = vmatmul.bf16.gmra.mxu0 %v1009_v28  ;;  %411 = vmatmul.bf16.gmra.mxu1 %v1017_v29 }
  0x82   :  { %451 = vmatmul.bf16.gmra.mxu2 %v1025_v34  ;;  %491 = vmatmul.bf16.gmra.mxu3 %v1033_v53 }
  0x91   :  { %376 = vmatmul.bf16.gmra.mxu0 %v1010_v32  ;;  %416 = vmatmul.bf16.gmra.mxu1 %v1018_v33 }
  0x92   :  { %456 = vmatmul.bf16.gmra.mxu2 %v1026_v38  ;;  %496 = vmatmul.bf16.gmra.mxu3 %v1034_v5 }
  0x9e   :  { %v342_v36 = vpop.f32.mrf.mxu0  ;;  %v1386_v37 = vpop.f32.mrf.mxu1 }
  0x9f   :  { %v699_v40 = vmul.f32 %v342_v36, %v342_v36 }
  0xa5   :  { %v1413_v60 = vpop.f32.mrf.mxu2  ;;  %v1464_v20 = vpop.f32.mrf.mxu3 }
  0xa6   :  { %v344_v41 = vpop.f32.mrf.mxu0  ;;  %v1394_v42 = vpop.f32.mrf.mxu1 }
  0xa7   :  { %v1046_v43 = vpack.c.bf16 %v344_v41, %v342_v36  ;;  %v630_v44 = vadd.f32 %v344_v41, %v342_v36  ;;  %v700_v45 = vmul.f32 %v344_v41, %v344_v41  ;;  %v1086_v46 = vpack.c.bf16 %v1394_v42, %v1386_v37 }
  0xa9   :  { %1047 = vst [vmem:[%s1787_s2] sm:$0xff] %v1046_v43   ;;  %v763_v47 = vadd.f32 %v700_v45, %v699_v40 }
  0xaa   :  { %1210 = vst [vmem:[%s1787_s2 + $0x40] sm:$0xff] %v1086_v46  }
  0xad   :  { %v1425_v2 = vpop.f32.mrf.mxu2  ;;  %v1476_v24 = vpop.f32.mrf.mxu3 }
  0xae   :  { %v347_v48 = vpop.f32.mrf.mxu0  ;;  %v1404_v49 = vpop.f32.mrf.mxu1  ;;  %v1126_v3 = vpack.c.bf16 %v1425_v2, %v1413_v60  ;;  %v1166_v26 = vpack.c.bf16 %v1476_v24, %v1464_v20 }
  0xaf   :  { %v631_v50 = vadd.f32 %v630_v44, %v347_v48  ;;  %v701_v51 = vmul.f32 %v347_v48, %v347_v48 }
  0xb0   :  { %1218 = vst [vmem:[%s1787_s2 + $0x80] sm:$0xff] %v1126_v3  }
  0xb1   :  { %v764_v52 = vadd.f32 %v763_v47, %v701_v51  ;;  %1226 = vst [vmem:[%s1787_s2 + $0xc0] sm:$0xff] %v1166_v26  }
  0xb5   :  { %v1441_v10 = vpop.f32.mrf.mxu2  ;;  %v1494_v32 = vpop.f32.mrf.mxu3 }
  0xb6   :  { %v349_v54 = vpop.f32.mrf.mxu0  ;;  %v1409_v55 = vpop.f32.mrf.mxu1 }
  0xb7   :  { %v1051_v56 = vpack.c.bf16 %v349_v54, %v347_v48  ;;  %v632_v57 = vadd.f32 %v631_v50, %v349_v54  ;;  %v702_v58 = vmul.f32 %v349_v54, %v349_v54  ;;  %v1091_v59 = vpack.c.bf16 %v1409_v55, %v1404_v49 }
  0xb9   :  { %1203 = vst [vmem:[%s1787_s2 + $0x8] sm:$0xff] %v1051_v56   ;;  %v765_v61 = vadd.f32 %v764_v52, %v702_v58 }
  0xba   :  { %1211 = vst [vmem:[%s1787_s2 + $0x48] sm:$0xff] %v1091_v59  }
  0xbd   :  { %v1451_v13 = vpop.f32.mrf.mxu2  ;;  %v1506_v36 = vpop.f32.mrf.mxu3 }
  0xbe   :  { %v352_v62 = vpop.f32.mrf.mxu0  ;;  %v1421_v63 = vpop.f32.mrf.mxu1  ;;  %v1131_v14 = vpack.c.bf16 %v1451_v13, %v1441_v10  ;;  %v1171_v39 = vpack.c.bf16 %v1506_v36, %v1494_v32 }
  0xbf   :  { %v1423_v0 = vadd.f32 %v632_v57, %v352_v62  ;;  %v703_v1 = vmul.f32 %v352_v62, %v352_v62 }
  0xc0   :  { %1219 = vst [vmem:[%s1787_s2 + $0x88] sm:$0xff] %v1131_v14  }
  0xc1   :  { %v1429_v4 = vadd.f32 %v765_v61, %v703_v1  ;;  %1227 = vst [vmem:[%s1787_s2 + $0xc8] sm:$0xff] %v1171_v39  }
  0xc5   :  { %v1462_v19 = vpop.f32.mrf.mxu2  ;;  %v1524_v46 = vpop.f32.mrf.mxu3 }
  0xc6   :  { %v354_v6 = vpop.f32.mrf.mxu0  ;;  %v1437_v7 = vpop.f32.mrf.mxu1 }
  0xc7   :  { %v1056_v8 = vpack.c.bf16 %v354_v6, %v352_v62  ;;  %v1096_v9 = vpack.c.bf16 %v1437_v7, %v1421_v63  ;;  %v704_v52 = vmul.f32 %v354_v6, %v354_v6  ;;  %v634_v57 = vadd.f32 %v1423_v0, %v354_v6 }
  0xc9   :  { %1204 = vst [vmem:[%s1787_s2 + $0x10] sm:$0xff] %v1056_v8   ;;  %v767_v58 = vadd.f32 %v1429_v4, %v704_v52 }
  0xca   :  { %1212 = vst [vmem:[%s1787_s2 + $0x50] sm:$0xff] %v1096_v9  }
  0xcd   :  { %v1474_v23 = vpop.f32.mrf.mxu2  ;;  %v1536_v51 = vpop.f32.mrf.mxu3 }
  0xce   :  { %v357_v11 = vpop.f32.mrf.mxu0  ;;  %v1449_v12 = vpop.f32.mrf.mxu1  ;;  %v1136_v25 = vpack.c.bf16 %v1474_v23, %v1462_v19  ;;  %v1176_v54 = vpack.c.bf16 %v1536_v51, %v1524_v46 }
  0xcf   :  { %v705_v56 = vmul.f32 %v357_v11, %v357_v11  ;;  %v635_v61 = vadd.f32 %v634_v57, %v357_v11 }
  0xd0   :  { %1220 = vst [vmem:[%s1787_s2 + $0x90] sm:$0xff] %v1136_v25  }
  0xd1   :  { %1228 = vst [vmem:[%s1787_s2 + $0xd0] sm:$0xff] %v1176_v54   ;;  %v768_v62 = vadd.f32 %v767_v58, %v705_v56 }
  0xd5   :  { %v1492_v31 = vpop.f32.mrf.mxu2  ;;  %v1556_v0 = vpop.f32.mrf.mxu3 }
  0xd6   :  { %v359_v15 = vpop.f32.mrf.mxu0  ;;  %v1458_v16 = vpop.f32.mrf.mxu1 }
  0xd7   :  { %v1061_v17 = vpack.c.bf16 %v359_v15, %v357_v11  ;;  %v1101_v18 = vpack.c.bf16 %v1458_v16, %v1449_v12  ;;  %v706_v59 = vmul.f32 %v359_v15, %v359_v15  ;;  %v636_v8 = vadd.f32 %v635_v61, %v359_v15 }
  0xd9   :  { %1205 = vst [vmem:[%s1787_s2 + $0x18] sm:$0xff] %v1061_v17   ;;  %v769_v6 = vadd.f32 %v768_v62, %v706_v59 }
  0xda   :  { %1213 = vst [vmem:[%s1787_s2 + $0x58] sm:$0xff] %v1101_v18  }
  0xdd   :  { %v1504_v35 = vpop.f32.mrf.mxu2 }
  0xde   :  { %v362_v21 = vpop.f32.mrf.mxu0  ;;  %v1472_v22 = vpop.f32.mrf.mxu1  ;;  %v1141_v38 = vpack.c.bf16 %v1504_v35, %v1492_v31 }
  0xdf   :  { %v707_v1 = vmul.f32 %v362_v21, %v362_v21  ;;  %v637_v25 = vadd.f32 %v636_v8, %v362_v21 }
  0xe0   :  { %1221 = vst [vmem:[%s1787_s2 + $0x98] sm:$0xff] %v1141_v38  }
  0xe1   :  { %v770_v4 = vadd.f32 %v769_v6, %v707_v1 }
  0xe5   :  { %v1522_v45 = vpop.f32.mrf.mxu2 }
  0xe6   :  { %v364_v27 = vpop.f32.mrf.mxu0  ;;  %v1488_v28 = vpop.f32.mrf.mxu1 }
  0xe7   :  { %v1066_v29 = vpack.c.bf16 %v364_v27, %v362_v21  ;;  %v1106_v30 = vpack.c.bf16 %v1488_v28, %v1472_v22  ;;  %v708_v18 = vmul.f32 %v364_v27, %v364_v27  ;;  %v638_v15 = vadd.f32 %v637_v25, %v364_v27 }
  0xe9   :  { %1206 = vst [vmem:[%s1787_s2 + $0x20] sm:$0xff] %v1066_v29   ;;  %v771_v26 = vadd.f32 %v770_v4, %v708_v18 }
  0xea   :  { %1214 = vst [vmem:[%s1787_s2 + $0x60] sm:$0xff] %v1106_v30  }
  0xed   :  { %v1534_v50 = vpop.f32.mrf.mxu2 }
  0xee   :  { %v367_v33 = vpop.f32.mrf.mxu0  ;;  %v1502_v34 = vpop.f32.mrf.mxu1  ;;  %v1146_v53 = vpack.c.bf16 %v1534_v50, %v1522_v45 }
  0xef   :  { %v709_v11 = vmul.f32 %v367_v33, %v367_v33  ;;  %v639_v30 = vadd.f32 %v638_v15, %v367_v33 }
  0xf0   :  { %1222 = vst [vmem:[%s1787_s2 + $0xa0] sm:$0xff] %v1146_v53   ;;  %v1568_v53 = vpop.f32.mrf.mxu3 }
  0xf1   :  { %v772_v38 = vadd.f32 %v771_v26, %v709_v11  ;;  %v1181_v27 = vpack.c.bf16 %v1568_v53, %v1556_v0  ;;  %v716_v26 = vmul.f32 %v1394_v42, %v1394_v42 }
  0xf3   :  { %1229 = vst [vmem:[%s1787_s2 + $0xd8] sm:$0xff] %v1181_v27  }
  0xf5   :  { %v1554_v17 = vpop.f32.mrf.mxu2 }
  0xf6   :  { %v369_v40 = vpop.f32.mrf.mxu0  ;;  %v1518_v41 = vpop.f32.mrf.mxu1 }
  0xf7   :  { %v1071_v43 = vpack.c.bf16 %v369_v40, %v367_v33  ;;  %v1111_v44 = vpack.c.bf16 %v1518_v41, %v1502_v34  ;;  %v710_v29 = vmul.f32 %v369_v40, %v369_v40  ;;  %v640_v21 = vadd.f32 %v639_v30, %v369_v40 }
  0xf8   :  { %v1586_v4 = vpop.f32.mrf.mxu3 }
  0xf9   :  { %1207 = vst [vmem:[%s1787_s2 + $0x28] sm:$0xff] %v1071_v43   ;;  %v773_v54 = vadd.f32 %v772_v38, %v710_v29  ;;  %v717_v38 = vmul.f32 %v1404_v49, %v1404_v49 }
  0xfa   :  { %1215 = vst [vmem:[%s1787_s2 + $0x68] sm:$0xff] %v1111_v44  }
  0xfd   :  { %v1566_v52 = vpop.f32.mrf.mxu2 }
  0xfe   :  { %v372_v47 = vpop.f32.mrf.mxu0  ;;  %v1532_v48 = vpop.f32.mrf.mxu1  ;;  %v1151_v57 = vpack.c.bf16 %v1566_v52, %v1554_v17 }
  0xff   :  { %v711_v39 = vmul.f32 %v372_v47, %v372_v47  ;;  %v641_v58 = vadd.f32 %v640_v21, %v372_v47 }
 0x100   :  { %1223 = vst [vmem:[%s1787_s2 + $0xa8] sm:$0xff] %v1151_v57   ;;  %v1608_v57 = vpop.f32.mrf.mxu3 }
 0x101   :  { %v774_v33 = vadd.f32 %v773_v54, %v711_v39  ;;  %v1186_v27 = vpack.c.bf16 %v1608_v57, %v1586_v4 }
 0x103   :  { %1230 = vst [vmem:[%s1787_s2 + $0xe0] sm:$0xff] %v1186_v27  }
 0x105   :  { %v1584_v25 = vpop.f32.mrf.mxu2 }
 0x106   :  { %v374_v3 = vpop.f32.mrf.mxu0  ;;  %v1550_v5 = vpop.f32.mrf.mxu1 }
 0x107   :  { %v1076_v9 = vpack.c.bf16 %v374_v3, %v372_v47  ;;  %v1116_v14 = vpack.c.bf16 %v1550_v5, %v1532_v48  ;;  %v712_v56 = vmul.f32 %v374_v3, %v374_v3  ;;  %v642_v40 = vadd.f32 %v641_v58, %v374_v3 }
 0x108   :  { %v715_v3 = vmul.f32 %v1386_v37, %v1386_v37  ;;  %v728_v27 = vmul.f32 %v1550_v5, %v1550_v5 }
 0x109   :  { %1208 = vst [vmem:[%s1787_s2 + $0x30] sm:$0xff] %v1076_v9   ;;  %v775_v61 = vadd.f32 %v774_v33, %v712_v56 }
 0x10a   :  { %1216 = vst [vmem:[%s1787_s2 + $0x70] sm:$0xff] %v1116_v14  }
 0x10d   :  { %v1606_v56 = vpop.f32.mrf.mxu2 }
 0x10e   :  { %v377_v43 = vpop.f32.mrf.mxu0  ;;  %v1564_v44 = vpop.f32.mrf.mxu1 }
 0x10f   :  { %v713_v59 = vmul.f32 %v377_v43, %v377_v43  ;;  %v643_v62 = vadd.f32 %v642_v40, %v377_v43 }
 0x111   :  { %v776_v1 = vadd.f32 %v775_v61, %v713_v59  ;;  %v721_v61 = vmul.f32 %v1449_v12, %v1449_v12 }
 0x116   :  { %v379_v8 = vpop.f32.mrf.mxu0  ;;  %v1580_v9 = vpop.f32.mrf.mxu1 }
 0x117   :  { %v1081_v14 = vpack.c.bf16 %v379_v8, %v377_v43  ;;  %v644_v6 = vadd.f32 %v643_v62, %v379_v8  ;;  %v714_v47 = vmul.f32 %v379_v8, %v379_v8  ;;  %v1121_v18 = vpack.c.bf16 %v1580_v9, %v1564_v44 }
 0x119   :  { %1209 = vst [vmem:[%s1787_s2 + $0x38] sm:$0xff] %v1081_v14   ;;  %v645_v11 = vadd.f32 %v644_v6, %v1386_v37  ;;  %v777_v15 = vadd.f32 %v776_v1, %v714_v47  ;;  %v718_v37 = vmul.f32 %v1409_v55, %v1409_v55  ;;  %v722_v1 = vmul.f32 %v1458_v16, %v1458_v16  ;;  %v1632_v6 = vpop.f32.mrf.mxu2 }
 0x11a   :  { %1217 = vst [vmem:[%s1787_s2 + $0x78] sm:$0xff] %v1121_v18   ;;  %v723_v47 = vmul.f32 %v1472_v22, %v1472_v22 }
 0x11b   :  { %v646_v29 = vadd.f32 %v645_v11, %v1394_v42  ;;  %v778_v30 = vadd.f32 %v777_v15, %v715_v3  ;;  %v1156_v42 = vpack.c.bf16 %v1606_v56, %v1584_v25  ;;  %v724_v11 = vmul.f32 %v1488_v28, %v1488_v28 }
 0x11d   :  { %v647_v39 = vadd.f32 %v646_v29, %v1404_v49  ;;  %v779_v43 = vadd.f32 %v778_v30, %v716_v26  ;;  %v719_v49 = vmul.f32 %v1421_v63, %v1421_v63  ;;  %1224 = vst [vmem:[%s1787_s2 + $0xb0] sm:$0xff] %v1156_v42   ;;  %v726_v30 = vmul.f32 %v1518_v41, %v1518_v41 }
 0x11f   :  { %v648_v21 = vadd.f32 %v647_v39, %v1409_v55  ;;  %v780_v54 = vadd.f32 %v779_v43, %v717_v38  ;;  %v720_v55 = vmul.f32 %v1437_v7, %v1437_v7 }
 0x121   :  { %v649_v58 = vadd.f32 %v648_v21, %v1421_v63  ;;  %v781_v33 = vadd.f32 %v780_v54, %v718_v37 }
 0x123   :  { %v650_v59 = vadd.f32 %v649_v58, %v1437_v7  ;;  %v782_v40 = vadd.f32 %v781_v33, %v719_v49  ;;  %v1634_v7 = vpop.f32.mrf.mxu3 }
 0x125   :  { %v783_v62 = vadd.f32 %v782_v40, %v720_v55  ;;  %v651_v63 = vadd.f32 %v650_v59, %v1449_v12  ;;  %v730_v59 = vmul.f32 %v1580_v9, %v1580_v9 }
 0x127   :  { %v652_v8 = vadd.f32 %v651_v63, %v1458_v16  ;;  %v784_v14 = vadd.f32 %v783_v62, %v721_v61  ;;  %v725_v16 = vmul.f32 %v1502_v34, %v1502_v34  ;;  %v732_v63 = vmul.f32 %v1425_v2, %v1425_v2 }
 0x129   :  { %v653_v18 = vadd.f32 %v652_v8, %v1472_v22  ;;  %v785_v3 = vadd.f32 %v784_v14, %v722_v1  ;;  %v1648_v22 = vpop.f32.mrf.mxu2  ;;  %v733_v8 = vmul.f32 %v1441_v10, %v1441_v10 }
 0x12b   :  { %v654_v12 = vadd.f32 %v653_v18, %v1488_v28  ;;  %v786_v15 = vadd.f32 %v785_v3, %v723_v47  ;;  %v1650_v43 = vpop.f32.mrf.mxu3  ;;  %v1161_v28 = vpack.c.bf16 %v1648_v22, %v1632_v6  ;;  %v734_v47 = vmul.f32 %v1451_v13, %v1451_v13 }
 0x12c   :  { %v1191_v37 = vpack.c.bf16 %v1650_v43, %v1634_v7 }
 0x12d   :  { %v655_v26 = vadd.f32 %v654_v12, %v1502_v34  ;;  %v787_v29 = vadd.f32 %v786_v15, %v724_v11  ;;  %v727_v34 = vmul.f32 %v1532_v48, %v1532_v48  ;;  %1225 = vst [vmem:[%s1787_s2 + $0xb8] sm:$0xff] %v1161_v28  }
 0x12e   :  { %1231 = vst [vmem:[%s1787_s2 + $0xe8] sm:$0xff] %v1191_v37   ;;  %v739_v37 = vmul.f32 %v1522_v45, %v1522_v45 }
 0x12f   :  { %v656_v38 = vadd.f32 %v655_v26, %v1518_v41  ;;  %v788_v39 = vadd.f32 %v787_v29, %v725_v16  ;;  %v737_v26 = vmul.f32 %v1492_v31, %v1492_v31 }
 0x131   :  { %v657_v21 = vadd.f32 %v656_v38, %v1532_v48  ;;  %v789_v54 = vadd.f32 %v788_v39, %v726_v30  ;;  %v729_v48 = vmul.f32 %v1564_v44, %v1564_v44 }
 0x133   :  { %v790_v41 = vadd.f32 %v789_v54, %v727_v34  ;;  %v658_v42 = vadd.f32 %v657_v21, %v1550_v5  ;;  %v1674_v40 = vpop.f32.mrf.mxu3  ;;  %v731_v5 = vmul.f32 %v1413_v60, %v1413_v60  ;;  %v740_v34 = vmul.f32 %v1534_v50, %v1534_v50 }
 0x135   :  { %v791_v49 = vadd.f32 %v790_v41, %v728_v27  ;;  %v659_v58 = vadd.f32 %v658_v42, %v1564_v44  ;;  %v741_v41 = vmul.f32 %v1554_v17, %v1554_v17 }
 0x137   :  { %v792_v33 = vadd.f32 %v791_v49, %v729_v48  ;;  %v660_v55 = vadd.f32 %v659_v58, %v1580_v9  ;;  %v742_v49 = vmul.f32 %v1566_v52, %v1566_v52 }
 0x139   :  { %v661_v61 = vadd.f32 %v660_v55, %v1413_v60  ;;  %v793_v62 = vadd.f32 %v792_v33, %v730_v59 }
 0x13b   :  { %v662_v1 = vadd.f32 %v661_v61, %v1425_v2  ;;  %v794_v44 = vadd.f32 %v793_v62, %v731_v5  ;;  %v1688_v60 = vpop.f32.mrf.mxu3  ;;  %v735_v2 = vmul.f32 %v1462_v19, %v1462_v19  ;;  %v745_v62 = vmul.f32 %v1632_v6, %v1632_v6 }
 0x13c   :  { %v1196_v11 = vpack.c.bf16 %v1688_v60, %v1674_v40 }
 0x13d   :  { %v663_v14 = vadd.f32 %v662_v1, %v1441_v10  ;;  %v795_v9 = vadd.f32 %v794_v44, %v732_v63  ;;  %v736_v10 = vmul.f32 %v1474_v23, %v1474_v23  ;;  %v747_v44 = vmul.f32 %v1464_v20, %v1464_v20 }
 0x13e   :  { %1232 = vst [vmem:[%s1787_s2 + $0xf0] sm:$0xff] %v1196_v11  }
 0x13f   :  { %v664_v18 = vadd.f32 %v663_v14, %v1451_v13  ;;  %v796_v3 = vadd.f32 %v795_v9, %v733_v8 }
 0x141   :  { %v665_v12 = vadd.f32 %v664_v18, %v1462_v19  ;;  %v797_v15 = vadd.f32 %v796_v3, %v734_v47  ;;  %v738_v19 = vmul.f32 %v1504_v35, %v1504_v35 }
 0x143   :  { %v666_v13 = vadd.f32 %v665_v12, %v1474_v23  ;;  %v798_v16 = vadd.f32 %v797_v15, %v735_v2  ;;  %v1707_v28 = vpop.f32.mrf.mxu3 }
 0x145   :  { %v799_v29 = vadd.f32 %v798_v16, %v736_v10  ;;  %v667_v30 = vadd.f32 %v666_v13, %v1492_v31 }
 0x147   :  { %v668_v38 = vadd.f32 %v667_v30, %v1504_v35  ;;  %v800_v39 = vadd.f32 %v799_v29, %v737_v26 }
 0x149   :  { %v669_v23 = vadd.f32 %v668_v38, %v1522_v45  ;;  %v801_v21 = vadd.f32 %v800_v39, %v738_v19 }
 0x14b   :  { %v670_v54 = vadd.f32 %v669_v23, %v1534_v50  ;;  %v802_v31 = vadd.f32 %v801_v21, %v739_v37  ;;  %v499_v45 = vpop.f32.mrf.mxu3  ;;  %v743_v50 = vmul.f32 %v1584_v25, %v1584_v25 }
 0x14c   :  { %v1201_v48 = vpack.c.bf16 %v499_v45, %v1707_v28 }
 0x14d   :  { %v671_v35 = vadd.f32 %v670_v54, %v1554_v17  ;;  %v803_v42 = vadd.f32 %v802_v31, %v740_v34  ;;  %v758_v34 = vmul.f32 %v1650_v43, %v1650_v43 }
 0x14e   :  { %1233 = vst [vmem:[%s1787_s2 + $0xf8] sm:$0xff] %v1201_v48   ;;  %v762_v48 = vmul.f32 %v499_v45, %v499_v45 }
 0x14f   :  { %v672_v27 = vadd.f32 %v671_v35, %v1566_v52  ;;  %v804_v58 = vadd.f32 %v803_v42, %v741_v41  ;;  %v744_v52 = vmul.f32 %v1606_v56, %v1606_v56  ;;  %v759_v41 = vmul.f32 %v1674_v40, %v1674_v40 }
 0x150   :  { %v760_v42 = vmul.f32 %v1688_v60, %v1688_v60 }
 0x151   :  { %v805_v33 = vadd.f32 %v804_v58, %v742_v49  ;;  %v673_v55 = vadd.f32 %v672_v27, %v1584_v25  ;;  %v746_v25 = vmul.f32 %v1648_v22, %v1648_v22  ;;  %v761_v49 = vmul.f32 %v1707_v28, %v1707_v28 }
 0x153   :  { %v806_v17 = vadd.f32 %v805_v33, %v743_v50  ;;  %v674_v59 = vadd.f32 %v673_v55, %v1606_v56  ;;  %v748_v56 = vmul.f32 %v1476_v24, %v1476_v24 }
 0x155   :  { %v807_v5 = vadd.f32 %v806_v17, %v744_v52  ;;  %v675_v61 = vadd.f32 %v674_v59, %v1632_v6  ;;  %v749_v6 = vmul.f32 %v1494_v32, %v1494_v32 }
 0x157   :  { %v808_v63 = vadd.f32 %v807_v5, %v745_v62  ;;  %v676_v1 = vadd.f32 %v675_v61, %v1648_v22  ;;  %v750_v22 = vmul.f32 %v1506_v36, %v1506_v36 }
 0x159   :  { %v677_v8 = vadd.f32 %v676_v1, %v1464_v20  ;;  %v809_v14 = vadd.f32 %v808_v63, %v746_v25  ;;  %v751_v20 = vmul.f32 %v1524_v46, %v1524_v46 }
 0x15b   :  { %v678_v9 = vadd.f32 %v677_v8, %v1476_v24  ;;  %v810_v47 = vadd.f32 %v809_v14, %v747_v44  ;;  %v752_v24 = vmul.f32 %v1536_v51, %v1536_v51 }
 0x15d   :  { %v679_v18 = vadd.f32 %v678_v9, %v1494_v32  ;;  %v811_v3 = vadd.f32 %v810_v47, %v748_v56  ;;  %v753_v32 = vmul.f32 %v1556_v0, %v1556_v0 }
 0x15f   :  { %v680_v11 = vadd.f32 %v679_v18, %v1506_v36  ;;  %v812_v2 = vadd.f32 %v811_v3, %v749_v6  ;;  %v754_v36 = vmul.f32 %v1568_v53, %v1568_v53 }
 0x161   :  { %v681_v12 = vadd.f32 %v680_v11, %v1524_v46  ;;  %v813_v15 = vadd.f32 %v812_v2, %v750_v22  ;;  %v755_v46 = vmul.f32 %v1586_v4, %v1586_v4 }
 0x163   :  { %v682_v10 = vadd.f32 %v681_v12, %v1536_v51  ;;  %v814_v13 = vadd.f32 %v813_v15, %v751_v20  ;;  %v756_v51 = vmul.f32 %v1608_v57, %v1608_v57 }
 0x165   :  { %v815_v16 = vadd.f32 %v814_v13, %v752_v24  ;;  %v683_v26 = vadd.f32 %v682_v10, %v1556_v0  ;;  %v757_v0 = vmul.f32 %v1634_v7, %v1634_v7 }
 0x167   :  { %v684_v29 = vadd.f32 %v683_v26, %v1568_v53  ;;  %v816_v30 = vadd.f32 %v815_v16, %v753_v32 }
 0x169   :  { %v685_v19 = vadd.f32 %v684_v29, %v1586_v4  ;;  %v817_v38 = vadd.f32 %v816_v30, %v754_v36 }
 0x16b   :  { %v686_v39 = vadd.f32 %v685_v19, %v1608_v57  ;;  %v818_v37 = vadd.f32 %v817_v38, %v755_v46 }
 0x16d   :  { %v687_v23 = vadd.f32 %v686_v39, %v1634_v7  ;;  %v819_v21 = vadd.f32 %v818_v37, %v756_v51 }
 0x16f   :  { %v688_v53 = vadd.f32 %v687_v23, %v1650_v43  ;;  %v820_v54 = vadd.f32 %v819_v21, %v757_v0 }
 0x171   :  { %v821_v4 = vadd.f32 %v820_v54, %v758_v34  ;;  %v689_v31 = vadd.f32 %v688_v53, %v1674_v40 }
 0x173   :  { %v822_v57 = vadd.f32 %v821_v4, %v759_v41  ;;  %v690_v35 = vadd.f32 %v689_v31, %v1688_v60 }
 0x175   :  { %v823_v7 = vadd.f32 %v822_v57, %v760_v42  ;;  %v691_v27 = vadd.f32 %v690_v35, %v1707_v28 }
 0x177   :  { %v824_v43 = vadd.f32 %v823_v7, %v761_v49  ;;  %v692_v58 = vadd.f32 %v691_v27, %v499_v45 }
 0x179   :  { %v693_v33 = vrot.slane %v692_v58, 4  ;;  %v825_v55 = vadd.f32 %v824_v43, %v762_v48 }
 0x17b   :  { %v694_v50 = vadd.f32 %v693_v33, %v692_v58  ;;  %v826_v17 = vrot.slane %v825_v55, 4 }
 0x17d   :  { %v695_v40 = vrot.slane %v694_v50, 2  ;;  %v827_v59 = vadd.f32 %v826_v17, %v825_v55 }
 0x17f   :  { %v696_v52 = vadd.f32 %v695_v40, %v694_v50  ;;  %v828_v5 = vrot.slane %v827_v59, 2 }
 0x181   :  { %v697_v61 = vrot.slane %v696_v52, 1  ;;  %v829_v62 = vadd.f32 %v828_v5, %v827_v59 }
 0x183   :  { %v830_v60 = vrot.slane %v829_v62, 1  ;;  %v698_v63 = vadd.f32 %v697_v61, %v696_v52 }
 0x185   :  { %v831_v1 = vadd.f32 %v830_v60, %v829_v62 }
 0x187   :  { %v833_v25 = vsel %vm832_vm0, %v698_v63, %v831_v1 }
 0x188   :  { %834 = vst [vmem:[%s1788_s3] sm:$0x3] %v833_v25 }

// kernel: discriminator_forward.6
= control target key start
LH: loop header
LB: loop body
LE: loop exit
PB: predicated region body
PF: predicated region fallthrough
CT: control target
= control target key end

     0   :  { %vm425_vm0 = vcmask 1040384   ;;  %s874_s1 = inlined_call_operand.vmem [shape: bf16[256,128], index: 1, kind: input, shape index: {}]   ;;  %s875_s0 = inlined_call_operand.vmem [shape: bf16[128,256], index: 0, kind: input, shape index: {}]   ;;  %s876_s2 = inlined_call_operand.vmem [shape: bf16[128,128], index: 2, kind: output, shape index: {0}]   ;;  %s877_s3 = inlined_call_operand.vmem [shape: f32[1,2,128], index: 3, kind: output, shape index: {1}]  }
   0x1   :  { %v587_v0 = vld [vmem:[%s874_s1 + $0x38] sm:$0xff]  ;;  %v586_v2 = vld [vmem:[%s874_s1 + $0x30] sm:$0xff]  ;;  %v585_v4 = vld [vmem:[%s874_s1 + $0x28] sm:$0xff] }
   0x2   :  { %v595_v1 = vld [vmem:[%s874_s1 + $0x78] sm:$0xff]  ;;  %237 = vmatpush.bf16.msra.mxu0 %v587_v0  ;;  %v594_v3 = vld [vmem:[%s874_s1 + $0x70] sm:$0xff]  ;;  %643 = vmatpush.bf16.msra.mxu2 %v587_v0  ;;  %v593_v5 = vld [vmem:[%s874_s1 + $0x68] sm:$0xff] }
   0x3   :  { %286 = vmatpush.bf16.msra.mxu1 %v595_v1  ;;  %651 = vmatpush.bf16.msra.mxu3 %v595_v1  ;;  %v584_v6 = vld [vmem:[%s874_s1 + $0x20] sm:$0xff]  ;;  %v583_v8 = vld [vmem:[%s874_s1 + $0x18] sm:$0xff]  ;;  %v582_v10 = vld [vmem:[%s874_s1 + $0x10] sm:$0xff] }
   0x4   :  { %v592_v7 = vld [vmem:[%s874_s1 + $0x60] sm:$0xff]  ;;  %v591_v9 = vld [vmem:[%s874_s1 + $0x58] sm:$0xff]  ;;  %v590_v11 = vld [vmem:[%s874_s1 + $0x50] sm:$0xff] }
   0x5   :  { %v581_v12 = vld [vmem:[%s874_s1 + $0x8] sm:$0xff]  ;;  %v580_v14 = vld [vmem:[%s874_s1] sm:$0xff]  ;;  %v446_v28 = vld [vmem:[%s875_s0 + $0x10] sm:$0xf] }
   0x6   :  { %238 = vmatpush.bf16.msra.mxu0 %v586_v2  ;;  %644 = vmatpush.bf16.msra.mxu2 %v586_v2  ;;  %v589_v13 = vld [vmem:[%s874_s1 + $0x48] sm:$0xff]  ;;  %v588_v15 = vld [vmem:[%s874_s1 + $0x40] sm:$0xff]  ;;  %v567_v29 = vld [vmem:[%s875_s0 + $0x14] sm:$0xf0] }
   0x7   :  { %287 = vmatpush.bf16.msra.mxu1 %v594_v3  ;;  %652 = vmatpush.bf16.msra.mxu3 %v594_v3  ;;  %v438_v16 = vld [vmem:[%s875_s0] sm:$0xf]  ;;  %v565_v17 = vld [vmem:[%s875_s0 + $0x4] sm:$0xf0]  ;;  %v564_v18 = vld [vmem:[%s875_s0 + $0x4] sm:$0xf]  ;;  %v447_v36 = vor.u32 %v567_v29, %v446_v28 }
   0x8   :  { %v440_v19 = vld [vmem:[%s875_s0 + $0x8] sm:$0xf0]  ;;  %v470_v20 = vld [vmem:[%s875_s0 + $0x40] sm:$0xf]  ;;  %v573_v21 = vld [vmem:[%s875_s0 + $0x44] sm:$0xf0]  ;;  %v439_v24 = vor.u32 %v565_v17, %v438_v16 }
   0x9   :  { %v572_v22 = vld [vmem:[%s875_s0 + $0x44] sm:$0xf]  ;;  %v472_v23 = vld [vmem:[%s875_s0 + $0x48] sm:$0xf0]  ;;  %v443_v25 = vor.u32 %v564_v18, %v440_v19  ;;  %v471_v26 = vor.u32 %v573_v21, %v470_v20  ;;  %v566_v30 = vld [vmem:[%s875_s0 + $0x14] sm:$0xf] }
   0xa   :  { %239 = vmatpush.bf16.msra.mxu0 %v585_v4  ;;  %645 = vmatpush.bf16.msra.mxu2 %v585_v4  ;;  %v475_v27 = vor.u32 %v572_v22, %v472_v23  ;;  %v448_v31 = vld [vmem:[%s875_s0 + $0x18] sm:$0xf0]  ;;  %v478_v32 = vld [vmem:[%s875_s0 + $0x50] sm:$0xf]  ;;  %v575_v33 = vld [vmem:[%s875_s0 + $0x54] sm:$0xf0] }
   0xb   :  { %288 = vmatpush.bf16.msra.mxu1 %v593_v5  ;;  %653 = vmatpush.bf16.msra.mxu3 %v593_v5  ;;  %v574_v34 = vld [vmem:[%s875_s0 + $0x54] sm:$0xf]  ;;  %v480_v35 = vld [vmem:[%s875_s0 + $0x58] sm:$0xf0]  ;;  %v451_v37 = vor.u32 %v566_v30, %v448_v31  ;;  %v479_v38 = vor.u32 %v575_v33, %v478_v32  ;;  %v454_v40 = vld [vmem:[%s875_s0 + $0x20] sm:$0xf] }
   0xc   :  { %v483_v39 = vor.u32 %v574_v34, %v480_v35  ;;  %v569_v41 = vld [vmem:[%s875_s0 + $0x24] sm:$0xf0]  ;;  %v568_v42 = vld [vmem:[%s875_s0 + $0x24] sm:$0xf]  ;;  %v456_v43 = vld [vmem:[%s875_s0 + $0x28] sm:$0xf0] }
   0xd   :  { %v486_v44 = vld [vmem:[%s875_s0 + $0x60] sm:$0xf]  ;;  %v577_v45 = vld [vmem:[%s875_s0 + $0x64] sm:$0xf0]  ;;  %v576_v46 = vld [vmem:[%s875_s0 + $0x64] sm:$0xf]  ;;  %v455_v48 = vor.u32 %v569_v41, %v454_v40  ;;  %v459_v49 = vor.u32 %v568_v42, %v456_v43 }
   0xe   :  { %240 = vmatpush.bf16.msra.mxu0 %v584_v6  ;;  %646 = vmatpush.bf16.msra.mxu2 %v584_v6  ;;  %v488_v47 = vld [vmem:[%s875_s0 + $0x68] sm:$0xf0]  ;;  %v487_v50 = vor.u32 %v577_v45, %v486_v44  ;;  %v462_v52 = vld [vmem:[%s875_s0 + $0x30] sm:$0xf]  ;;  %v571_v53 = vld [vmem:[%s875_s0 + $0x34] sm:$0xf0] }
   0xf   :  { %289 = vmatpush.bf16.msra.mxu1 %v592_v7  ;;  %654 = vmatpush.bf16.msra.mxu3 %v592_v7  ;;  %v491_v51 = vor.u32 %v576_v46, %v488_v47  ;;  %v570_v54 = vld [vmem:[%s875_s0 + $0x34] sm:$0xf]  ;;  %v464_v55 = vld [vmem:[%s875_s0 + $0x38] sm:$0xf0]  ;;  %v494_v56 = vld [vmem:[%s875_s0 + $0x70] sm:$0xf]  ;;  %v463_v60 = vor.u32 %v571_v53, %v462_v52 }
  0x10   :  { %v579_v57 = vld [vmem:[%s875_s0 + $0x74] sm:$0xf0]  ;;  %v578_v58 = vld [vmem:[%s875_s0 + $0x74] sm:$0xf]  ;;  %v496_v59 = vld [vmem:[%s875_s0 + $0x78] sm:$0xf0]  ;;  %v467_v61 = vor.u32 %v570_v54, %v464_v55 }
  0x11   :  { %v495_v62 = vor.u32 %v579_v57, %v494_v56  ;;  %v499_v63 = vor.u32 %v578_v58, %v496_v59 }
  0x12   :  { %241 = vmatpush.bf16.msra.mxu0 %v583_v8  ;;  %647 = vmatpush.bf16.msra.mxu2 %v583_v8 }
  0x13   :  { %290 = vmatpush.bf16.msra.mxu1 %v591_v9  ;;  %655 = vmatpush.bf16.msra.mxu3 %v591_v9 }
  0x16   :  { %242 = vmatpush.bf16.msra.mxu0 %v582_v10  ;;  %648 = vmatpush.bf16.msra.mxu2 %v582_v10 }
  0x17   :  { %291 = vmatpush.bf16.msra.mxu1 %v590_v11  ;;  %656 = vmatpush.bf16.msra.mxu3 %v590_v11 }
  0x1a   :  { %243 = vmatpush.bf16.msra.mxu0 %v581_v12  ;;  %649 = vmatpush.bf16.msra.mxu2 %v581_v12 }
  0x1b   :  { %292 = vmatpush.bf16.msra.mxu1 %v589_v13  ;;  %657 = vmatpush.bf16.msra.mxu3 %v589_v13 }
  0x1e   :  { %244 = vmatpush.bf16.msra.mxu0 %v580_v14  ;;  %650 = vmatpush.bf16.msra.mxu2 %v580_v14 }
  0x1f   :  { %293 = vmatpush.bf16.msra.mxu1 %v588_v15  ;;  %658 = vmatpush.bf16.msra.mxu3 %v588_v15 }
  0x21   :  { %245 = vmatmul.bf16.vlgmr.msra.gmra.mxu0 %v439_v24  ;;  %265 = vmatmul.bf16.vlgmr.msra.gmra.mxu2 %v471_v26 }
  0x22   :  { %294 = vmatmul.bf16.vlgmr.msra.gmra.mxu1 %v443_v25  ;;  %314 = vmatmul.bf16.vlgmr.msra.gmra.mxu3 %v475_v27 }
  0x31   :  { %250 = vmatmul.bf16.gmra.mxu0 %v447_v36  ;;  %270 = vmatmul.bf16.gmra.mxu2 %v479_v38 }
  0x32   :  { %299 = vmatmul.bf16.gmra.mxu1 %v451_v37  ;;  %319 = vmatmul.bf16.gmra.mxu3 %v483_v39 }
  0x41   :  { %255 = vmatmul.bf16.gmra.mxu0 %v455_v48  ;;  %275 = vmatmul.bf16.gmra.mxu2 %v487_v50 }
  0x42   :  { %304 = vmatmul.bf16.gmra.mxu1 %v459_v49  ;;  %324 = vmatmul.bf16.gmra.mxu3 %v491_v51 }
  0x51   :  { %260 = vmatmul.bf16.gmra.mxu0 %v463_v60  ;;  %280 = vmatmul.bf16.gmra.mxu2 %v495_v62 }
  0x52   :  { %309 = vmatmul.bf16.gmra.mxu1 %v467_v61  ;;  %329 = vmatmul.bf16.gmra.mxu3 %v499_v63 }
  0x9e   :  { %v246_v0 = vpop.f32.mrf.mxu0 }
  0x9f   :  { %v295_v1 = vpop.f32.mrf.mxu1 }
  0xa0   :  { %v296_v6 = vadd.f32 %v295_v1, %v246_v0 }
  0xa2   :  { %v388_v39 = vmul.f32 %v296_v6, %v296_v6 }
  0xa4   :  { %v266_v2 = vpop.f32.mrf.mxu2 }
  0xa5   :  { %v315_v3 = vpop.f32.mrf.mxu3 }
  0xa6   :  { %v248_v4 = vpop.f32.mrf.mxu0  ;;  %v826_v9 = vadd.f32 %v315_v3, %v266_v2 }
  0xa7   :  { %v297_v5 = vpop.f32.mrf.mxu1 }
  0xa8   :  { %v298_v7 = vadd.f32 %v297_v5, %v248_v4 }
  0xaa   :  { %v599_v8 = vpack.c.bf16 %v298_v7, %v296_v6  ;;  %v389_v37 = vmul.f32 %v298_v7, %v298_v7  ;;  %v367_v40 = vadd.f32 %v298_v7, %v296_v6 }
  0xac   :  { %600 = vst [vmem:[%s876_s2] sm:$0xff] %v599_v8   ;;  %v268_v10 = vpop.f32.mrf.mxu2  ;;  %v404_v47 = vadd.f32 %v389_v37, %v388_v39  ;;  %v396_v8 = vmul.f32 %v826_v9, %v826_v9 }
  0xad   :  { %v317_v11 = vpop.f32.mrf.mxu3 }
  0xae   :  { %v251_v12 = vpop.f32.mrf.mxu0  ;;  %v828_v14 = vadd.f32 %v317_v11, %v268_v10 }
  0xaf   :  { %v300_v13 = vpop.f32.mrf.mxu1 }
  0xb0   :  { %v619_v15 = vpack.c.bf16 %v828_v14, %v826_v9  ;;  %v301_v20 = vadd.f32 %v300_v13, %v251_v12  ;;  %v397_v13 = vmul.f32 %v828_v14, %v828_v14 }
  0xb2   :  { %639 = vst [vmem:[%s876_s2 + $0x20] sm:$0xff] %v619_v15   ;;  %v390_v41 = vmul.f32 %v301_v20, %v301_v20  ;;  %v368_v48 = vadd.f32 %v367_v40, %v301_v20 }
  0xb4   :  { %v271_v16 = vpop.f32.mrf.mxu2  ;;  %v405_v51 = vadd.f32 %v404_v47, %v390_v41 }
  0xb5   :  { %v320_v17 = vpop.f32.mrf.mxu3 }
  0xb6   :  { %v253_v18 = vpop.f32.mrf.mxu0  ;;  %v838_v23 = vadd.f32 %v320_v17, %v271_v16 }
  0xb7   :  { %v302_v19 = vpop.f32.mrf.mxu1 }
  0xb8   :  { %v303_v21 = vadd.f32 %v302_v19, %v253_v18 }
  0xba   :  { %v604_v22 = vpack.c.bf16 %v303_v21, %v301_v20  ;;  %v391_v49 = vmul.f32 %v303_v21, %v303_v21  ;;  %v369_v52 = vadd.f32 %v368_v48, %v303_v21  ;;  %v398_v20 = vmul.f32 %v838_v23, %v838_v23 }
  0xbc   :  { %636 = vst [vmem:[%s876_s2 + $0x8] sm:$0xff] %v604_v22   ;;  %v273_v24 = vpop.f32.mrf.mxu2  ;;  %v406_v55 = vadd.f32 %v405_v51, %v391_v49 }
  0xbd   :  { %v322_v25 = vpop.f32.mrf.mxu3 }
  0xbe   :  { %v256_v26 = vpop.f32.mrf.mxu0  ;;  %v840_v28 = vadd.f32 %v322_v25, %v273_v24 }
  0xbf   :  { %v305_v27 = vpop.f32.mrf.mxu1 }
  0xc0   :  { %v624_v29 = vpack.c.bf16 %v840_v28, %v838_v23  ;;  %v306_v34 = vadd.f32 %v305_v27, %v256_v26 }
  0xc2   :  { %640 = vst [vmem:[%s876_s2 + $0x28] sm:$0xff] %v624_v29   ;;  %v392_v53 = vmul.f32 %v306_v34, %v306_v34  ;;  %v370_v56 = vadd.f32 %v369_v52, %v306_v34 }
  0xc4   :  { %v276_v30 = vpop.f32.mrf.mxu2  ;;  %v407_v58 = vadd.f32 %v406_v55, %v392_v53 }
  0xc5   :  { %v325_v31 = vpop.f32.mrf.mxu3 }
  0xc6   :  { %v258_v32 = vpop.f32.mrf.mxu0  ;;  %v326_v38 = vadd.f32 %v325_v31, %v276_v30 }
  0xc7   :  { %v307_v33 = vpop.f32.mrf.mxu1 }
  0xc8   :  { %v308_v35 = vadd.f32 %v307_v33, %v258_v32 }
  0xca   :  { %v609_v36 = vpack.c.bf16 %v308_v35, %v306_v34  ;;  %v393_v57 = vmul.f32 %v308_v35, %v308_v35  ;;  %v371_v59 = vadd.f32 %v370_v56, %v308_v35 }
  0xcc   :  { %637 = vst [vmem:[%s876_s2 + $0x10] sm:$0xff] %v609_v36   ;;  %v278_v42 = vpop.f32.mrf.mxu2  ;;  %v408_v1 = vadd.f32 %v407_v58, %v393_v57 }
  0xcd   :  { %v327_v43 = vpop.f32.mrf.mxu3 }
  0xce   :  { %v261_v44 = vpop.f32.mrf.mxu0  ;;  %v328_v46 = vadd.f32 %v327_v43, %v278_v42 }
  0xcf   :  { %v310_v45 = vpop.f32.mrf.mxu1 }
  0xd0   :  { %v629_v50 = vpack.c.bf16 %v328_v46, %v326_v38  ;;  %v311_v54 = vadd.f32 %v310_v45, %v261_v44  ;;  %v401_v30 = vmul.f32 %v328_v46, %v328_v46 }
  0xd2   :  { %641 = vst [vmem:[%s876_s2 + $0x30] sm:$0xff] %v629_v50   ;;  %v394_v60 = vmul.f32 %v311_v54, %v311_v54  ;;  %v372_v2 = vadd.f32 %v371_v59, %v311_v54 }
  0xd4   :  { %v281_v61 = vpop.f32.mrf.mxu2  ;;  %v409_v4 = vadd.f32 %v408_v1, %v394_v60 }
  0xd5   :  { %v330_v62 = vpop.f32.mrf.mxu3 }
  0xd6   :  { %v263_v63 = vpop.f32.mrf.mxu0  ;;  %v331_v12 = vadd.f32 %v330_v62, %v281_v61 }
  0xd7   :  { %v312_v0 = vpop.f32.mrf.mxu1 }
  0xd8   :  { %v313_v3 = vadd.f32 %v312_v0, %v263_v63 }
  0xda   :  { %v614_v5 = vpack.c.bf16 %v313_v3, %v311_v54  ;;  %v373_v6 = vadd.f32 %v372_v2, %v313_v3  ;;  %v395_v7 = vmul.f32 %v313_v3, %v313_v3 }
  0xdc   :  { %638 = vst [vmem:[%s876_s2 + $0x18] sm:$0xff] %v614_v5   ;;  %v374_v10 = vadd.f32 %v373_v6, %v826_v9  ;;  %v410_v11 = vadd.f32 %v409_v4, %v395_v7  ;;  %v283_v17 = vpop.f32.mrf.mxu2  ;;  %v399_v9 = vmul.f32 %v840_v28, %v840_v28 }
  0xdd   :  { %v332_v18 = vpop.f32.mrf.mxu3 }
  0xde   :  { %v375_v15 = vadd.f32 %v374_v10, %v828_v14  ;;  %v411_v16 = vadd.f32 %v410_v11, %v396_v8  ;;  %v333_v19 = vadd.f32 %v332_v18, %v283_v17  ;;  %v400_v14 = vmul.f32 %v326_v38, %v326_v38 }
  0xe0   :  { %v376_v21 = vadd.f32 %v375_v15, %v838_v23  ;;  %v412_v22 = vadd.f32 %v411_v16, %v397_v13  ;;  %v634_v24 = vpack.c.bf16 %v333_v19, %v331_v12  ;;  %v402_v23 = vmul.f32 %v331_v12, %v331_v12 }
  0xe1   :  { %v403_v37 = vmul.f32 %v333_v19, %v333_v19 }
  0xe2   :  { %v413_v25 = vadd.f32 %v412_v22, %v398_v20  ;;  %v377_v26 = vadd.f32 %v376_v21, %v840_v28  ;;  %642 = vst [vmem:[%s876_s2 + $0x38] sm:$0xff] %v634_v24  }
  0xe4   :  { %v378_v27 = vadd.f32 %v377_v26, %v326_v38  ;;  %v414_v29 = vadd.f32 %v413_v25, %v399_v9 }
  0xe6   :  { %v379_v31 = vadd.f32 %v378_v27, %v328_v46  ;;  %v415_v32 = vadd.f32 %v414_v29, %v400_v14 }
  0xe8   :  { %v380_v33 = vadd.f32 %v379_v31, %v331_v12  ;;  %v416_v34 = vadd.f32 %v415_v32, %v401_v30 }
  0xea   :  { %v417_v35 = vadd.f32 %v416_v34, %v402_v23  ;;  %v381_v36 = vadd.f32 %v380_v33, %v333_v19 }
  0xec   :  { %v382_v39 = vrot.slane %v381_v36, 4  ;;  %v418_v40 = vadd.f32 %v417_v35, %v403_v37 }
  0xee   :  { %v383_v41 = vadd.f32 %v382_v39, %v381_v36  ;;  %v419_v28 = vrot.slane %v418_v40, 4 }
  0xf0   :  { %v384_v42 = vrot.slane %v383_v41, 2  ;;  %v420_v43 = vadd.f32 %v419_v28, %v418_v40 }
  0xf2   :  { %v385_v44 = vadd.f32 %v384_v42, %v383_v41  ;;  %v421_v45 = vrot.slane %v420_v43, 2 }
  0xf4   :  { %v386_v47 = vrot.slane %v385_v44, 1  ;;  %v422_v38 = vadd.f32 %v421_v45, %v420_v43 }
  0xf6   :  { %v423_v48 = vrot.slane %v422_v38, 1  ;;  %v387_v46 = vadd.f32 %v386_v47, %v385_v44 }
  0xf8   :  { %v424_v49 = vadd.f32 %v423_v48, %v422_v38 }
  0xfa   :  { %v426_v50 = vsel %vm425_vm0, %v387_v46, %v424_v49 }
  0xfb   :  { %427 = vst [vmem:[%s877_s3] sm:$0x3] %v426_v50 }

// kernel: discriminator_forward.7
= control target key start
LH: loop header
LB: loop body
LE: loop exit
PB: predicated region body
PF: predicated region fallthrough
CT: control target
= control target key end

     0   :  { %vm423_vm0 = vcmask 1040384   ;;  %s818_s1 = inlined_call_operand.vmem [shape: bf16[512,128], index: 1, kind: input, shape index: {}]   ;;  %s819_s0 = inlined_call_operand.vmem [shape: bf16[32,512], index: 0, kind: input, shape index: {}]   ;;  %s820_s2 = inlined_call_operand.vmem [shape: bf16[32,128], index: 2, kind: output, shape index: {0}]   ;;  %s821_s3 = inlined_call_operand.vmem [shape: f32[1,2,128], index: 3, kind: output, shape index: {1}]  }
   0x1   :  { %v609_v0 = vld [vmem:[%s818_s1 + $0x38] sm:$0xff]  ;;  %v608_v4 = vld [vmem:[%s818_s1 + $0x30] sm:$0xff]  ;;  %v607_v8 = vld [vmem:[%s818_s1 + $0x28] sm:$0xff] }
   0x2   :  { %v617_v1 = vld [vmem:[%s818_s1 + $0x78] sm:$0xff]  ;;  %317 = vmatpush.bf16.msra.mxu0 %v609_v0  ;;  %v616_v5 = vld [vmem:[%s818_s1 + $0x70] sm:$0xff]  ;;  %v615_v9 = vld [vmem:[%s818_s1 + $0x68] sm:$0xff] }
   0x3   :  { %v625_v2 = vld [vmem:[%s818_s1 + $0xb8] sm:$0xff]  ;;  %336 = vmatpush.bf16.msra.mxu1 %v617_v1  ;;  %v624_v6 = vld [vmem:[%s818_s1 + $0xb0] sm:$0xff]  ;;  %v623_v10 = vld [vmem:[%s818_s1 + $0xa8] sm:$0xff] }
   0x4   :  { %v633_v3 = vld [vmem:[%s818_s1 + $0xf8] sm:$0xff]  ;;  %355 = vmatpush.bf16.msra.mxu2 %v625_v2  ;;  %v632_v7 = vld [vmem:[%s818_s1 + $0xf0] sm:$0xff]  ;;  %v631_v11 = vld [vmem:[%s818_s1 + $0xe8] sm:$0xff] }
   0x5   :  { %374 = vmatpush.bf16.msra.mxu3 %v633_v3  ;;  %v606_v12 = vld [vmem:[%s818_s1 + $0x20] sm:$0xff]  ;;  %v605_v16 = vld [vmem:[%s818_s1 + $0x18] sm:$0xff]  ;;  %v604_v20 = vld [vmem:[%s818_s1 + $0x10] sm:$0xff] }
   0x6   :  { %318 = vmatpush.bf16.msra.mxu0 %v608_v4  ;;  %v614_v13 = vld [vmem:[%s818_s1 + $0x60] sm:$0xff]  ;;  %v613_v17 = vld [vmem:[%s818_s1 + $0x58] sm:$0xff]  ;;  %v612_v21 = vld [vmem:[%s818_s1 + $0x50] sm:$0xff] }
   0x7   :  { %337 = vmatpush.bf16.msra.mxu1 %v616_v5  ;;  %v622_v14 = vld [vmem:[%s818_s1 + $0xa0] sm:$0xff]  ;;  %v621_v18 = vld [vmem:[%s818_s1 + $0x98] sm:$0xff]  ;;  %v620_v22 = vld [vmem:[%s818_s1 + $0x90] sm:$0xff] }
   0x8   :  { %356 = vmatpush.bf16.msra.mxu2 %v624_v6  ;;  %v630_v15 = vld [vmem:[%s818_s1 + $0xe0] sm:$0xff]  ;;  %v629_v19 = vld [vmem:[%s818_s1 + $0xd8] sm:$0xff]  ;;  %v628_v23 = vld [vmem:[%s818_s1 + $0xd0] sm:$0xff] }
   0x9   :  { %375 = vmatpush.bf16.msra.mxu3 %v632_v7  ;;  %v603_v24 = vld [vmem:[%s818_s1 + $0x8] sm:$0xff]  ;;  %v602_v28 = vld [vmem:[%s818_s1] sm:$0xff]  ;;  %v596_v33 = vld [vmem:[%s819_s0 + $0xc] sm:$0xf0] }
   0xa   :  { %319 = vmatpush.bf16.msra.mxu0 %v607_v8  ;;  %v611_v25 = vld [vmem:[%s818_s1 + $0x48] sm:$0xff]  ;;  %v610_v29 = vld [vmem:[%s818_s1 + $0x40] sm:$0xff]  ;;  %v438_v35 = vld [vmem:[%s819_s0 + $0x10] sm:$0xf0] }
   0xb   :  { %338 = vmatpush.bf16.msra.mxu1 %v615_v9  ;;  %v619_v26 = vld [vmem:[%s818_s1 + $0x88] sm:$0xff]  ;;  %v618_v30 = vld [vmem:[%s818_s1 + $0x80] sm:$0xff]  ;;  %v597_v37 = vld [vmem:[%s819_s0 + $0x14] sm:$0xf0] }
   0xc   :  { %357 = vmatpush.bf16.msra.mxu2 %v623_v10  ;;  %v627_v27 = vld [vmem:[%s818_s1 + $0xc8] sm:$0xff]  ;;  %v626_v31 = vld [vmem:[%s818_s1 + $0xc0] sm:$0xff]  ;;  %v446_v39 = vld [vmem:[%s819_s0 + $0x18] sm:$0xf0] }
   0xd   :  { %376 = vmatpush.bf16.msra.mxu3 %v631_v11  ;;  %v436_v32 = vld [vmem:[%s819_s0] sm:$0xf]  ;;  %v594_v34 = vld [vmem:[%s819_s0 + $0x4] sm:$0xf]  ;;  %v444_v36 = vld [vmem:[%s819_s0 + $0x8] sm:$0xf] }
   0xe   :  { %320 = vmatpush.bf16.msra.mxu0 %v606_v12  ;;  %v595_v38 = vld [vmem:[%s819_s0 + $0xc] sm:$0xf]  ;;  %v437_v40 = vor.u32 %v596_v33, %v436_v32  ;;  %v441_v41 = vor.u32 %v594_v34, %v438_v35  ;;  %v445_v42 = vor.u32 %v597_v37, %v444_v36  ;;  %v452_v44 = vld [vmem:[%s819_s0 + $0x20] sm:$0xf]  ;;  %v600_v45 = vld [vmem:[%s819_s0 + $0x2c] sm:$0xf0] }
   0xf   :  { %339 = vmatpush.bf16.msra.mxu1 %v614_v13  ;;  %v449_v43 = vor.u32 %v595_v38, %v446_v39  ;;  %v598_v46 = vld [vmem:[%s819_s0 + $0x24] sm:$0xf]  ;;  %v454_v47 = vld [vmem:[%s819_s0 + $0x30] sm:$0xf0]  ;;  %v460_v48 = vld [vmem:[%s819_s0 + $0x28] sm:$0xf]  ;;  %v453_v52 = vor.u32 %v600_v45, %v452_v44 }
  0x10   :  { %358 = vmatpush.bf16.msra.mxu2 %v622_v14  ;;  %v601_v49 = vld [vmem:[%s819_s0 + $0x34] sm:$0xf0]  ;;  %v599_v50 = vld [vmem:[%s819_s0 + $0x2c] sm:$0xf]  ;;  %v462_v51 = vld [vmem:[%s819_s0 + $0x38] sm:$0xf0]  ;;  %v457_v53 = vor.u32 %v598_v46, %v454_v47 }
  0x11   :  { %377 = vmatpush.bf16.msra.mxu3 %v630_v15  ;;  %v461_v54 = vor.u32 %v601_v49, %v460_v48  ;;  %v465_v55 = vor.u32 %v599_v50, %v462_v51 }
  0x12   :  { %321 = vmatpush.bf16.msra.mxu0 %v605_v16 }
  0x13   :  { %340 = vmatpush.bf16.msra.mxu1 %v613_v17 }
  0x14   :  { %359 = vmatpush.bf16.msra.mxu2 %v621_v18 }
  0x15   :  { %378 = vmatpush.bf16.msra.mxu3 %v629_v19 }
  0x16   :  { %322 = vmatpush.bf16.msra.mxu0 %v604_v20 }
  0x17   :  { %341 = vmatpush.bf16.msra.mxu1 %v612_v21 }
  0x18   :  { %360 = vmatpush.bf16.msra.mxu2 %v620_v22 }
  0x19   :  { %379 = vmatpush.bf16.msra.mxu3 %v628_v23 }
  0x1a   :  { %323 = vmatpush.bf16.msra.mxu0 %v603_v24 }
  0x1b   :  { %342 = vmatpush.bf16.msra.mxu1 %v611_v25 }
  0x1c   :  { %361 = vmatpush.bf16.msra.mxu2 %v619_v26 }
  0x1d   :  { %380 = vmatpush.bf16.msra.mxu3 %v627_v27 }
  0x1e   :  { %324 = vmatpush.bf16.msra.mxu0 %v602_v28 }
  0x1f   :  { %343 = vmatpush.bf16.msra.mxu1 %v610_v29 }
  0x20   :  { %362 = vmatpush.bf16.msra.mxu2 %v618_v30 }
  0x21   :  { %381 = vmatpush.bf16.msra.mxu3 %v626_v31  ;;  %325 = vmatmul.bf16.vlgmr.msra.gmra.mxu0 %v437_v40 }
  0x22   :  { %344 = vmatmul.bf16.vlgmr.msra.gmra.mxu1 %v441_v41 }
  0x23   :  { %363 = vmatmul.bf16.vlgmr.msra.gmra.mxu2 %v445_v42 }
  0x24   :  { %382 = vmatmul.bf16.vlgmr.msra.gmra.mxu3 %v449_v43 }
  0x31   :  { %330 = vmatmul.bf16.gmra.mxu0 %v453_v52 }
  0x32   :  { %349 = vmatmul.bf16.gmra.mxu1 %v457_v53 }
  0x33   :  { %368 = vmatmul.bf16.gmra.mxu2 %v461_v54 }
  0x34   :  { %387 = vmatmul.bf16.gmra.mxu3 %v465_v55 }
  0x9e   :  { %v326_v56 = vpop.f32.mrf.mxu0 }
  0x9f   :  { %v345_v57 = vpop.f32.mrf.mxu1 }
  0xa0   :  { %v346_v62 = vadd.f32 %v345_v57, %v326_v56 }
  0xa6   :  { %v364_v58 = vpop.f32.mrf.mxu2  ;;  %v328_v60 = vpop.f32.mrf.mxu0 }
  0xa7   :  { %v383_v59 = vpop.f32.mrf.mxu3  ;;  %v347_v61 = vpop.f32.mrf.mxu1  ;;  %v365_v63 = vadd.f32 %v364_v58, %v346_v62 }
  0xa8   :  { %v348_v0 = vadd.f32 %v347_v61, %v328_v60 }
  0xa9   :  { %v384_v6 = vadd.f32 %v383_v59, %v365_v63 }
  0xab   :  { %v410_v19 = vmul.f32 %v384_v6, %v384_v6 }
  0xae   :  { %v366_v1 = vpop.f32.mrf.mxu2  ;;  %v331_v4 = vpop.f32.mrf.mxu0 }
  0xaf   :  { %v385_v2 = vpop.f32.mrf.mxu3  ;;  %v367_v3 = vadd.f32 %v366_v1, %v348_v0  ;;  %v350_v5 = vpop.f32.mrf.mxu1 }
  0xb0   :  { %v351_v9 = vadd.f32 %v350_v5, %v331_v4 }
  0xb1   :  { %v386_v7 = vadd.f32 %v385_v2, %v367_v3 }
  0xb3   :  { %v637_v8 = vpack.c.bf16 %v386_v7, %v384_v6  ;;  %v411_v16 = vmul.f32 %v386_v7, %v386_v7  ;;  %v401_v20 = vadd.f32 %v386_v7, %v384_v6 }
  0xb5   :  { %638 = vst [vmem:[%s820_s2] sm:$0xff] %v637_v8   ;;  %v414_v24 = vadd.f32 %v411_v16, %v410_v19 }
  0xb6   :  { %v369_v10 = vpop.f32.mrf.mxu2  ;;  %v333_v13 = vpop.f32.mrf.mxu0 }
  0xb7   :  { %v388_v11 = vpop.f32.mrf.mxu3  ;;  %v370_v12 = vadd.f32 %v369_v10, %v351_v9  ;;  %v352_v14 = vpop.f32.mrf.mxu1 }
  0xb8   :  { %v353_v17 = vadd.f32 %v352_v14, %v333_v13 }
  0xb9   :  { %v389_v15 = vadd.f32 %v388_v11, %v370_v12 }
  0xbb   :  { %v412_v21 = vmul.f32 %v389_v15, %v389_v15  ;;  %v402_v25 = vadd.f32 %v401_v20, %v389_v15 }
  0xbd   :  { %v415_v27 = vadd.f32 %v414_v24, %v412_v21 }
  0xbe   :  { %v371_v18 = vpop.f32.mrf.mxu2 }
  0xbf   :  { %v372_v22 = vadd.f32 %v371_v18, %v353_v17  ;;  %v390_v23 = vpop.f32.mrf.mxu3 }
  0xc1   :  { %v391_v26 = vadd.f32 %v390_v23, %v372_v22 }
  0xc3   :  { %v642_v28 = vpack.c.bf16 %v391_v26, %v389_v15  ;;  %v403_v29 = vadd.f32 %v402_v25, %v391_v26  ;;  %v413_v30 = vmul.f32 %v391_v26, %v391_v26 }
  0xc5   :  { %644 = vst [vmem:[%s820_s2 + $0x8] sm:$0xff] %v642_v28   ;;  %v404_v31 = vrot.slane %v403_v29, 4  ;;  %v416_v32 = vadd.f32 %v415_v27, %v413_v30 }
  0xc7   :  { %v405_v33 = vadd.f32 %v404_v31, %v403_v29  ;;  %v417_v34 = vrot.slane %v416_v32, 4 }
  0xc9   :  { %v406_v35 = vrot.slane %v405_v33, 2  ;;  %v418_v36 = vadd.f32 %v417_v34, %v416_v32 }
  0xcb   :  { %v407_v37 = vadd.f32 %v406_v35, %v405_v33  ;;  %v419_v38 = vrot.slane %v418_v36, 2 }
  0xcd   :  { %v408_v39 = vrot.slane %v407_v37, 1  ;;  %v420_v40 = vadd.f32 %v419_v38, %v418_v36 }
  0xcf   :  { %v421_v41 = vrot.slane %v420_v40, 1  ;;  %v409_v42 = vadd.f32 %v408_v39, %v407_v37 }
  0xd1   :  { %v422_v43 = vadd.f32 %v421_v41, %v420_v40 }
  0xd3   :  { %v424_v44 = vsel %vm423_vm0, %v409_v42, %v422_v43 }
  0xd4   :  { %425 = vst [vmem:[%s821_s3] sm:$0x3] %v424_v44 }

</bundles_post_ra>
